<compile_context>
chip_gen: v7x
topology: tpu7x:2x2x1
jax: 0.10.0
libtpu: 0.0.40
codegen_flags: <defaults>
</compile_context>

<pallas_src>
import jax
import jax.numpy as jnp
from jax import lax
from jax.experimental import pallas as pl
from jax.experimental.pallas import tpu as pltpu

# ---- small, module-consistent shapes -----------------------------------------
B = 2
C, H, W = 3, 16, 16
CHW = C * H * W            # 768 = 6 * 128 (lane friendly)
D_IN = 128                 # encoder feature dim (module: resnet50 last_dim = 2048)
STYLE = 128                # style_dim   (module default 512)
LATENT = 128               # latent_dim  (module default 512)
CONVERT = 128              # convert_dim (module default 512)
N_MLP = 8                  # module default
FINAL_DIMS = (80, 64, 80, 3, 27, 2, 1)
N_COEFF = sum(FINAL_DIMS)  # 257
FIN_PAD = 384              # 257 padded to a lane-dense multiple of 128
HEAD_COLS = 2 * STYLE + N_MLP * LATENT + FIN_PAD   # 1664
BN_EPS = 1e-5
PN_EPS = 1e-8


# ---- shared math helpers (used by the kernel AND the plain-JAX mirror) ---------
def _leaky(x):
    return jnp.where(x > 0, x, 0.2 * x)


def _batchnorm_train(x):
    # nn.BatchNorm1d (train mode, fresh module): biased batch variance, gamma=1, beta=0.
    # One fused axis-0 reduction over [x | x*x]; clamp the variance at 0 to guard the
    # E[x^2]-E[x]^2 cancellation at batch size 2.
    n, f = x.shape
    s = jnp.sum(jnp.concatenate([x, x * x], axis=1), axis=0, keepdims=True) * (1.0 / n)
    m, ex2 = s[:, :f], s[:, f:]
    v = jnp.maximum(ex2 - m * m, 0.0)
    return (x - m) * lax.rsqrt(v + BN_EPS)


def _bdot(a, w):
    # Single-pass bf16 MXU matmul with f32 accumulation (weights already bf16).
    return jnp.dot(a.astype(jnp.bfloat16), w, preferred_element_type=jnp.float32)


# ---- the kernel: full Generator forward (hot path) ----------------------------
def generator_kernel(img_ref, mask_ref, eps_ref,
                     enc_w_ref, enc_b_ref,
                     head_w_ref, head_b_ref,
                     in_w_ref, in_b_ref,
                     lin_wl_hbm, fin_wl_hbm,
                     coeff_ref, mu_ref, logvar_ref,
                     lin_wl_vmem, fin_wl_vmem, dma_sem):
    # Kick off the HBM->VMEM copies of the late-used weights (loop matrices + fused
    # final head) so their DMA hides behind the encoder / head / input-layer compute.
    lin_cp = pltpu.make_async_copy(lin_wl_hbm, lin_wl_vmem, dma_sem.at[0])
    fin_cp = pltpu.make_async_copy(fin_wl_hbm, fin_wl_vmem, dma_sem.at[1])
    lin_cp.start()
    fin_cp.start()

    b = eps_ref.shape[0]

    # img_ref/mask_ref are pre-stacked [image; image] / [mask; 1-mask]: one masked
    # multiply + ONE stacked encode matmul covers both the corrupted and reverse streams.
    # TODO(synk): the ResNet50 image backbone has no compact Pallas equivalent; it is
    # replaced by a single deterministic linear projection of the flattened image.
    stacked = img_ref[...] * mask_ref[...]                               # (2B, CHW) f32
    enc = _bdot(stacked, enc_w_ref[...]) + enc_b_ref[...]                # (2B, D_IN)

    # ONE fused head matmul over the stacked encoder output:
    #   columns = [mu | logvar | folded conv->lin_wc blocks 0..7 | final-head x-part]
    # mu/logvar use the reverse-stream rows, the x-conditioned parts use the corrupted
    # stream rows (the "wasted" rows are free: the MXU pads to 8 sublanes anyway).
    head = _bdot(enc, head_w_ref[...]) + head_b_ref[...]                 # (2B, 1664)
    mu = head[b:, :STYLE]
    logvar = head[b:, STYLE:2 * STYLE]
    xwide = head[:b, 2 * STYLE:]                                         # (B, 8L + 384)

    # Decoder reparameterization (eps replaces torch.randn_like).
    std = jnp.exp(0.5 * logvar)
    style = eps_ref[...] * std + mu

    # input_layer: PixelNorm -> Linear -> LeakyReLU(0.2) -> BatchNorm1d (train)
    pn = style * lax.rsqrt(jnp.mean(style * style, axis=1, keepdims=True) + PN_EPS)
    h = _bdot(pn, in_w_ref[...]) + in_b_ref[...]
    latent = _batchnorm_train(_leaky(h))                                 # (B, LATENT)

    # Serial MLP chain: one (B,L)x(L,L) bf16 matmul + VPU/EUP work per block; the
    # x-conditioned contributions were hoisted into `xwide` above.
    lin_cp.wait()
    for i in range(N_MLP):
        h = _bdot(latent, lin_wl_vmem[i]) + xwide[:, i * LATENT:(i + 1) * LATENT]
        latent = _batchnorm_train(_leaky(h))

    # 7 final heads fused into one lane-dense 384-wide output (sliced to 257 outside).
    fin_cp.wait()
    coeff_ref[...] = _bdot(latent, fin_wl_vmem[...]) + xwide[:, N_MLP * LATENT:]
    mu_ref[...] = mu
    logvar_ref[...] = logvar


# ---- offline weight packing (done once; not on the hot path) -------------------
def pack_params(p):
    f32 = lambda a: a.astype(jnp.float32)
    bf16 = lambda a: a.astype(jnp.bfloat16)
    hi = jax.lax.Precision.HIGHEST

    # Fold each convert_layer into the convert-half of its linear_layer:
    #   (x @ conv_w + conv_b) @ lin_wc + lin_b == x @ (conv_w @ lin_wc) + (conv_b @ lin_wc + lin_b)
    w_eff = jnp.einsum("nik,nkj->nij", f32(p["conv_w"]), f32(p["lin_wc"]), precision=hi)
    b_eff = jnp.einsum("nok,nkj->noj", f32(p["conv_b"]), f32(p["lin_wc"]), precision=hi) \
        + f32(p["lin_b"])
    w_eff = jnp.transpose(w_eff, (1, 0, 2)).reshape(D_IN, N_MLP * LATENT)
    b_eff = jnp.transpose(b_eff, (1, 0, 2)).reshape(1, N_MLP * LATENT)

    # Final heads: split (LATENT + D_IN, 257) into latent- and x-halves, pad to 384 lanes.
    fin_w = f32(p["fin_w"])
    pad = FIN_PAD - N_COEFF
    fin_wl = jnp.pad(fin_w[:LATENT], ((0, 0), (0, pad)))
    fin_wx = jnp.pad(fin_w[LATENT:], ((0, 0), (0, pad)))
    fin_b = jnp.pad(f32(p["fin_b"]), ((0, 0), (0, pad)))

    # Fuse mu/logvar head + all x-side loop-invariant weights into ONE head operand.
    muvar_w = jnp.concatenate([f32(p["mu_w"]), f32(p["var_w"])], axis=1)
    muvar_b = jnp.concatenate([f32(p["mu_b"]), f32(p["var_b"])], axis=1)
    head_w = bf16(jnp.concatenate([muvar_w, w_eff, fin_wx], axis=1))     # (D_IN, 1664)
    head_b = jnp.concatenate([muvar_b, b_eff, fin_b], axis=1)            # (1,   1664) f32

    return dict(
        enc_w=bf16(p["enc_w"]), enc_b=f32(p["enc_b"]),
        head_w=head_w, head_b=head_b,
        in_w=bf16(p["in_w"]), in_b=f32(p["in_b"]),
        lin_wl=bf16(p["lin_wl"]),                                        # (8, L, L) bf16
        fin_wl=bf16(fin_wl),                                             # (L, 384)  bf16
    )


# ---- wrapper (hot path) ---------------------------------------------------------
@jax.jit
def generator_forward(packed, input_image, mask, eps):
    b = input_image.shape[0]
    img2d = input_image.reshape(b, -1).astype(jnp.float32)   # torch.flatten(x, 1) on NCHW
    mask2d = mask.reshape(b, -1).astype(jnp.float32)

    # Layout plumbing only: present [image; image] and [mask; 1-mask] stacked along the
    # batch axis so the two encoder calls become a single (2B, CHW) matmul in-kernel.
    img_stk = jnp.concatenate([img2d, img2d], axis=0)
    mask_stk = jnp.concatenate([mask2d, 1.0 - mask2d], axis=0)

    inputs = (img_stk, mask_stk, eps.astype(jnp.float32),
              packed["enc_w"], packed["enc_b"],
              packed["head_w"], packed["head_b"],
              packed["in_w"], packed["in_b"],
              packed["lin_wl"], packed["fin_wl"])

    vmem = lambda: pl.BlockSpec(memory_space=pltpu.MemorySpace.VMEM)
    hbm = lambda: pl.BlockSpec(memory_space=pl.ANY)     # manual DMA inside the kernel
    in_specs = [vmem()] * 9 + [hbm(), hbm()]            # lin_wl, fin_wl are late-used

    out_shape = (jax.ShapeDtypeStruct((b, FIN_PAD), jnp.float32),
                 jax.ShapeDtypeStruct((b, STYLE), jnp.float32),
                 jax.ShapeDtypeStruct((b, STYLE), jnp.float32))

    coeff_pad, mu, logvar = pl.pallas_call(
        generator_kernel,
        out_shape=out_shape,
        in_specs=in_specs,
        out_specs=(vmem(), vmem(), vmem()),
        scratch_shapes=[pltpu.VMEM((N_MLP, LATENT, LATENT), jnp.bfloat16),
                        pltpu.VMEM((LATENT, FIN_PAD), jnp.bfloat16),
                        pltpu.SemaphoreType.DMA((2,))],
        cost_estimate=pl.CostEstimate(flops=3_500_000, transcendentals=1_500,
                                      bytes_accessed=1_200_000),
    )(*inputs)
    return coeff_pad[:, :N_COEFF], mu, logvar


# ---- deterministic parameter init (synthetic; mirrors nn.Linear default) --------
def init_params(key):
    def lin(k, fan_in, fan_out):
        bound = 1.0 / (fan_in ** 0.5)
        kw, kb = jax.random.split(k)
        w = jax.random.uniform(kw, (fan_in, fan_out), jnp.float32, -bound, bound)
        b = jax.random.uniform(kb, (1, fan_out), jnp.float32, -bound, bound)
        return w, b

    keys = jax.random.split(key, 4 + 2 * N_MLP)
    enc_w, enc_b = lin(keys[0], CHW, D_IN)
    mu_w, mu_b = lin(keys[1], D_IN, STYLE)
    var_w, var_b = lin(keys[2], D_IN, STYLE)
    in_w, in_b = lin(keys[3], STYLE, LATENT)

    conv_w, conv_b, lin_wl, lin_wc, lin_b = [], [], [], [], []
    for i in range(N_MLP):
        cw, cb = lin(keys[4 + 2 * i], D_IN, CONVERT)
        # nn.Linear(latent_dim + convert_dim, latent_dim), split along its input dim.
        lw, lb = lin(keys[5 + 2 * i], LATENT + CONVERT, LATENT)
        conv_w.append(cw); conv_b.append(cb)
        lin_wl.append(lw[:LATENT]); lin_wc.append(lw[LATENT:]); lin_b.append(lb)

    return dict(
        enc_w=enc_w, enc_b=enc_b,
        mu_w=mu_w, mu_b=mu_b, var_w=var_w, var_b=var_b,
        in_w=in_w, in_b=in_b,
        conv_w=jnp.stack(conv_w), conv_b=jnp.stack(conv_b),
        lin_wl=jnp.stack(lin_wl), lin_wc=jnp.stack(lin_wc), lin_b=jnp.stack(lin_b),
        # final_layers: nn.init.constant_(weight, 0) / constant_(bias, 0)
        fin_w=jnp.zeros((LATENT + D_IN, N_COEFF), jnp.float32),
        fin_b=jnp.zeros((1, N_COEFF), jnp.float32),
    )


# ---- pure-JAX reference (original, unfused module structure; f32 HIGHEST) -------
def reference_forward(params, input_image, mask, eps):
    hi = jax.lax.Precision.HIGHEST
    mm = lambda a, w: jnp.dot(a, w, precision=hi)
    b = input_image.shape[0]
    img = input_image.reshape(b, -1).astype(jnp.float32)
    m = mask.reshape(b, -1).astype(jnp.float32)

    enc = lambda z: mm(z, params["enc_w"]) + params["enc_b"]
    x = enc(img * m)
    x_rev = enc(img * (1.0 - m))

    mu = mm(x_rev, params["mu_w"]) + params["mu_b"]
    logvar = mm(x_rev, params["var_w"]) + params["var_b"]
    style = eps * jnp.exp(0.5 * logvar) + mu

    pn = style * lax.rsqrt(jnp.mean(style * style, axis=1, keepdims=True) + PN_EPS)
    latent = _batchnorm_train(_leaky(mm(pn, params["in_w"]) + params["in_b"]))
    for i in range(N_MLP):
        cond = mm(x, params["conv_w"][i]) + params["conv_b"][i]
        h = (mm(latent, params["lin_wl"][i]) + mm(cond, params["lin_wc"][i])
             + params["lin_b"][i])
        latent = _batchnorm_train(_leaky(h))
    coeff = mm(jnp.concatenate([latent, x], axis=1), params["fin_w"]) + params["fin_b"]
    return coeff, mu, logvar


# ---- plain-JAX mirror of the packed/fused computation (numerics-matched) ---------
def mirror_forward(packed, img2d, mask2d, eps):
    # Mirrors exactly what the wrapper + kernel compute (same packed weights, same bf16
    # dots, same op order).  Used to validate the Pallas plumbing end-to-end: comparing
    # against a differently-composed f32 reference is chaotic here because BatchNorm
    # over a batch of 2 amplifies tiny precision deltas over the 9-layer chain.
    b = img2d.shape[0]
    img_stk = jnp.concatenate([img2d, img2d], axis=0)
    mask_stk = jnp.concatenate([mask2d, 1.0 - mask2d], axis=0)
    enc = _bdot(img_stk * mask_stk, packed["enc_w"]) + packed["enc_b"]
    head = _bdot(enc, packed["head_w"]) + packed["head_b"]
    mu = head[b:, :STYLE]
    logvar = head[b:, STYLE:2 * STYLE]
    xwide = head[:b, 2 * STYLE:]
    style = eps * jnp.exp(0.5 * logvar) + mu
    pn = style * lax.rsqrt(jnp.mean(style * style, axis=1, keepdims=True) + PN_EPS)
    latent = _batchnorm_train(_leaky(_bdot(pn, packed["in_w"]) + packed["in_b"]))
    for i in range(N_MLP):
        h = _bdot(latent, packed["lin_wl"][i]) + xwide[:, i * LATENT:(i + 1) * LATENT]
        latent = _batchnorm_train(_leaky(h))
    coeff = _bdot(latent, packed["fin_wl"]) + xwide[:, N_MLP * LATENT:]
    return coeff[:, :N_COEFF], mu, logvar


# ---- direct validation of the offline fold / packing algebra --------------------
def packing_check(params, packed, input_image, mask):
    # Checks the conv->linear fold, layout transpose/reshape, mu/logvar fusion and the
    # final-head split + lane padding against the unfused module composition, all in
    # f32 HIGHEST and *upstream* of the ill-conditioned BatchNorm chain.
    hi = jax.lax.Precision.HIGHEST
    mm = lambda a, w: jnp.dot(a, w.astype(jnp.float32), precision=hi)
    b = input_image.shape[0]
    img = input_image.reshape(b, -1).astype(jnp.float32)
    msk = mask.reshape(b, -1).astype(jnp.float32)
    x = mm(img * msk, params["enc_w"]) + params["enc_b"]
    x_rev = mm(img * (1.0 - msk), params["enc_w"]) + params["enc_b"]

    got_x = mm(x, packed["head_w"]) + packed["head_b"]
    got_rev = mm(x_rev, packed["head_w"]) + packed["head_b"]
    close = lambda a, bb: bool(jnp.allclose(a, bb, atol=1e-2, rtol=1e-2))

    ok = True
    # mu / logvar columns
    ok &= close(got_rev[:, :STYLE], mm(x_rev, params["mu_w"]) + params["mu_b"])
    ok &= close(got_rev[:, STYLE:2 * STYLE], mm(x_rev, params["var_w"]) + params["var_b"])
    # folded convert_layer -> linear_layer(convert half) blocks
    for i in range(N_MLP):
        cond = mm(x, params["conv_w"][i]) + params["conv_b"][i]
        want = mm(cond, params["lin_wc"][i]) + params["lin_b"][i]
        blk = got_x[:, 2 * STYLE + i * LATENT: 2 * STYLE + (i + 1) * LATENT]
        ok &= close(blk, want)
    # final-head x-half + bias, zero lane padding, and latent-half of the final heads
    fin_cols = got_x[:, 2 * STYLE + N_MLP * LATENT:]
    ok &= close(fin_cols[:, :N_COEFF], mm(x, params["fin_w"][LATENT:]) + params["fin_b"])
    ok &= bool(jnp.all(fin_cols[:, N_COEFF:] == 0.0))
    want_fwl = jnp.pad(params["fin_w"][:LATENT], ((0, 0), (0, FIN_PAD - N_COEFF)))
    ok &= close(packed["fin_wl"].astype(jnp.float32), want_fwl)
    return ok


if __name__ == "__main__":
    key = jax.random.PRNGKey(0)
    kimg, kmask, keps, kparam, kfw, kfb = jax.random.split(key, 6)

    input_image = jax.random.normal(kimg, (B, C, H, W), jnp.float32)
    mask = (jax.random.uniform(kmask, (B, C, H, W)) > 0.5).astype(jnp.float32)
    eps = jax.random.normal(keps, (B, STYLE), jnp.float32)   # replaces torch.randn_like

    # --- run 1: faithful module init (zero-initialized final heads) -------------
    params = init_params(kparam)
    packed = pack_params(params)
    coeff, mu, logvar = generator_forward(packed, input_image, mask, eps)
    jax.block_until_ready((coeff, mu, logvar))

    ref_coeff, ref_mu, ref_logvar = reference_forward(params, input_image, mask, eps)
    assert coeff.shape == (B, N_COEFF) and mu.shape == (B, STYLE) and logvar.shape == (B, STYLE)
    assert bool(jnp.all(coeff == 0.0))          # zero-initialized final heads -> all-zero coeffs
    assert bool(jnp.all(ref_coeff == 0.0))
    assert bool(jnp.allclose(mu, ref_mu, atol=2e-2, rtol=2e-2))
    assert bool(jnp.allclose(logvar, ref_logvar, atol=2e-2, rtol=2e-2))

    # --- run 2: randomized final heads exercise the full fused/folded latent path ---
    bound = 1.0 / ((LATENT + D_IN) ** 0.5)
    params2 = dict(params)
    params2["fin_w"] = jax.random.uniform(kfw, (LATENT + D_IN, N_COEFF), jnp.float32,
                                          -bound, bound)
    params2["fin_b"] = jax.random.uniform(kfb, (1, N_COEFF), jnp.float32, -bound, bound)
    packed2 = pack_params(params2)

    # (a) fold / packing algebra vs the unfused module composition (well-conditioned).
    assert packing_check(params2, packed2, input_image, mask)

    # (b) end-to-end kernel plumbing vs the numerics-matched plain-JAX mirror.
    coeff2, mu2, logvar2 = generator_forward(packed2, input_image, mask, eps)
    jax.block_until_ready((coeff2, mu2, logvar2))
    img2d = input_image.reshape(B, -1).astype(jnp.float32)
    mask2d = mask.reshape(B, -1).astype(jnp.float32)
    mir_coeff, mir_mu, mir_logvar = mirror_forward(packed2, img2d, mask2d, eps)
    assert bool(jnp.allclose(mu2, mir_mu, atol=1e-2, rtol=1e-2))
    assert bool(jnp.allclose(logvar2, mir_logvar, atol=1e-2, rtol=1e-2))
    assert bool(jnp.allclose(coeff2, mir_coeff, atol=5e-2, rtol=5e-2))

    print("KERNEL_OK")
</pallas_src>

<mosaic_0001>
module attributes {stable_mosaic.version = 11 : i64} {
  func.func @generator_kernel(%arg0: memref<4x768xf32, #tpu.memory_space<vmem>>, %arg1: memref<4x768xf32, #tpu.memory_space<vmem>>, %arg2: memref<2x128xf32, #tpu.memory_space<vmem>>, %arg3: memref<768x128xbf16, #tpu.memory_space<vmem>>, %arg4: memref<1x128xf32, #tpu.memory_space<vmem>>, %arg5: memref<128x1664xbf16, #tpu.memory_space<vmem>>, %arg6: memref<1x1664xf32, #tpu.memory_space<vmem>>, %arg7: memref<128x128xbf16, #tpu.memory_space<vmem>>, %arg8: memref<1x128xf32, #tpu.memory_space<vmem>>, %arg9: memref<8x128x128xbf16, #tpu.memory_space<any>>, %arg10: memref<128x384xbf16, #tpu.memory_space<any>>, %arg11: memref<2x384xf32, #tpu.memory_space<vmem>>, %arg12: memref<2x128xf32, #tpu.memory_space<vmem>>, %arg13: memref<2x128xf32, #tpu.memory_space<vmem>>, %arg14: memref<8x128x128xbf16, #tpu.memory_space<vmem>>, %arg15: memref<128x384xbf16, #tpu.memory_space<vmem>>, %arg16: memref<2x!tpu.dma_semaphore, #tpu.memory_space<semaphore_mem>>) attributes {dimension_semantics = [], scalar_prefetch = 0 : i64, scratch_operands = 3 : i64, tpu.core_type = #tpu.core_type<tc>} {
    %c0_i32 = arith.constant 0 : i32
    %0 = tpu.memref_slice %arg16[%c0_i32] : memref<2x!tpu.dma_semaphore, #tpu.memory_space<semaphore_mem>> -> memref<1x!tpu.dma_semaphore, #tpu.memory_space<semaphore_mem>>
    %1 = tpu.memref_squeeze %0 : memref<1x!tpu.dma_semaphore, #tpu.memory_space<semaphore_mem>> -> memref<!tpu.dma_semaphore, #tpu.memory_space<semaphore_mem>>
    tpu.enqueue_dma source(%arg9 : memref<8x128x128xbf16, #tpu.memory_space<any>>) target(%arg14 : memref<8x128x128xbf16, #tpu.memory_space<vmem>>) target_semaphore(%1 : memref<!tpu.dma_semaphore, #tpu.memory_space<semaphore_mem>>)
    %c1_i32 = arith.constant 1 : i32
    %2 = tpu.memref_slice %arg16[%c1_i32] : memref<2x!tpu.dma_semaphore, #tpu.memory_space<semaphore_mem>> -> memref<1x!tpu.dma_semaphore, #tpu.memory_space<semaphore_mem>>
    %3 = tpu.memref_squeeze %2 : memref<1x!tpu.dma_semaphore, #tpu.memory_space<semaphore_mem>> -> memref<!tpu.dma_semaphore, #tpu.memory_space<semaphore_mem>>
    tpu.enqueue_dma source(%arg10 : memref<128x384xbf16, #tpu.memory_space<any>>) target(%arg15 : memref<128x384xbf16, #tpu.memory_space<vmem>>) target_semaphore(%3 : memref<!tpu.dma_semaphore, #tpu.memory_space<semaphore_mem>>)
    %c0 = arith.constant 0 : index
    %c0_0 = arith.constant 0 : index
    %4 = vector.load %arg0[%c0, %c0_0] : memref<4x768xf32, #tpu.memory_space<vmem>>, vector<4x768xf32>
    %c0_1 = arith.constant 0 : index
    %c0_2 = arith.constant 0 : index
    %5 = vector.load %arg1[%c0_1, %c0_2] : memref<4x768xf32, #tpu.memory_space<vmem>>, vector<4x768xf32>
    %6 = arith.mulf %4, %5 : vector<4x768xf32>
    %c0_3 = arith.constant 0 : index
    %c0_4 = arith.constant 0 : index
    %7 = vector.load %arg3[%c0_3, %c0_4] : memref<768x128xbf16, #tpu.memory_space<vmem>>, vector<768x128xbf16>
    %8 = arith.truncf %6 : vector<4x768xf32> to vector<4x768xbf16>
    %cst = arith.constant dense<0.000000e+00> : vector<4x128xf32>
    %9 = tpu.matmul %8, %7, %cst {dimension_numbers = #tpu.dot_dimension_numbers<[1], [0], [0], [1], [0, 0, 1, 1], [], []>} : vector<4x768xbf16>, vector<768x128xbf16>, vector<4x128xf32> -> vector<4x128xf32>
    %c0_5 = arith.constant 0 : index
    %c0_6 = arith.constant 0 : index
    %10 = vector.load %arg4[%c0_5, %c0_6] : memref<1x128xf32, #tpu.memory_space<vmem>>, vector<1x128xf32>
    %11 = vector.broadcast %10 : vector<1x128xf32> to vector<4x128xf32>
    %12 = arith.addf %9, %11 : vector<4x128xf32>
    %c0_7 = arith.constant 0 : index
    %c0_8 = arith.constant 0 : index
    %13 = vector.load %arg5[%c0_7, %c0_8] : memref<128x1664xbf16, #tpu.memory_space<vmem>>, vector<128x1664xbf16>
    %14 = arith.truncf %12 : vector<4x128xf32> to vector<4x128xbf16>
    %cst_9 = arith.constant dense<0.000000e+00> : vector<4x1664xf32>
    %15 = tpu.matmul %14, %13, %cst_9 {dimension_numbers = #tpu.dot_dimension_numbers<[1], [0], [0], [1], [0, 0, 1, 1], [], []>} : vector<4x128xbf16>, vector<128x1664xbf16>, vector<4x1664xf32> -> vector<4x1664xf32>
    %c0_10 = arith.constant 0 : index
    %c0_11 = arith.constant 0 : index
    %16 = vector.load %arg6[%c0_10, %c0_11] : memref<1x1664xf32, #tpu.memory_space<vmem>>, vector<1x1664xf32>
    %17 = vector.broadcast %16 : vector<1x1664xf32> to vector<4x1664xf32>
    %18 = arith.addf %15, %17 : vector<4x1664xf32>
    %19 = vector.extract_strided_slice %18 {offsets = [2, 0], sizes = [2, 128], strides = [1, 1]} : vector<4x1664xf32> to vector<2x128xf32>
    %20 = vector.extract_strided_slice %18 {offsets = [2, 128], sizes = [2, 128], strides = [1, 1]} : vector<4x1664xf32> to vector<2x128xf32>
    %21 = vector.extract_strided_slice %18 {offsets = [0, 256], sizes = [2, 1408], strides = [1, 1]} : vector<4x1664xf32> to vector<2x1408xf32>
    %cst_12 = arith.constant 5.000000e-01 : f32
    %22 = vector.broadcast %cst_12 : f32 to vector<2x128xf32>
    %23 = arith.mulf %22, %20 : vector<2x128xf32>
    %24 = math.exp %23 : vector<2x128xf32>
    %c0_13 = arith.constant 0 : index
    %c0_14 = arith.constant 0 : index
    %25 = vector.load %arg2[%c0_13, %c0_14] : memref<2x128xf32, #tpu.memory_space<vmem>>, vector<2x128xf32>
    %26 = arith.mulf %25, %24 : vector<2x128xf32>
    %27 = arith.addf %26, %19 : vector<2x128xf32>
    %28 = arith.mulf %27, %27 : vector<2x128xf32>
    %cst_15 = arith.constant dense<0.000000e+00> : vector<2xf32>
    %29 = vector.multi_reduction <add>, %28, %cst_15 [1] : vector<2x128xf32> to vector<2xf32>
    %30 = vector.shape_cast %29 : vector<2xf32> to vector<2x1xf32>
    %cst_16 = arith.constant 1.280000e+02 : f32
    %31 = vector.broadcast %cst_16 : f32 to vector<2x1xf32>
    %32 = arith.divf %30, %31 : vector<2x1xf32>
    %cst_17 = arith.constant 9.99999993E-9 : f32
    %33 = vector.broadcast %cst_17 : f32 to vector<2x1xf32>
    %34 = arith.addf %32, %33 : vector<2x1xf32>
    %35 = math.rsqrt %34 : vector<2x1xf32>
    %36 = vector.broadcast %35 : vector<2x1xf32> to vector<2x128xf32>
    %37 = arith.mulf %27, %36 : vector<2x128xf32>
    %c0_18 = arith.constant 0 : index
    %c0_19 = arith.constant 0 : index
    %38 = vector.load %arg7[%c0_18, %c0_19] : memref<128x128xbf16, #tpu.memory_space<vmem>>, vector<128x128xbf16>
    %39 = arith.truncf %37 : vector<2x128xf32> to vector<2x128xbf16>
    %cst_20 = arith.constant dense<0.000000e+00> : vector<2x128xf32>
    %40 = tpu.matmul %39, %38, %cst_20 {dimension_numbers = #tpu.dot_dimension_numbers<[1], [0], [0], [1], [0, 0, 1, 1], [], []>} : vector<2x128xbf16>, vector<128x128xbf16>, vector<2x128xf32> -> vector<2x128xf32>
    %c0_21 = arith.constant 0 : index
    %c0_22 = arith.constant 0 : index
    %41 = vector.load %arg8[%c0_21, %c0_22] : memref<1x128xf32, #tpu.memory_space<vmem>>, vector<1x128xf32>
    %42 = vector.broadcast %41 : vector<1x128xf32> to vector<2x128xf32>
    %43 = arith.addf %40, %42 : vector<2x128xf32>
    %cst_23 = arith.constant 0.000000e+00 : f32
    %44 = vector.broadcast %cst_23 : f32 to vector<2x128xf32>
    %45 = arith.cmpf ogt, %43, %44 : vector<2x128xf32>
    %cst_24 = arith.constant 2.000000e-01 : f32
    %46 = vector.broadcast %cst_24 : f32 to vector<2x128xf32>
    %47 = arith.mulf %46, %43 : vector<2x128xf32>
    %48 = arith.select %45, %43, %47 : vector<2x128xi1>, vector<2x128xf32>
    %49 = arith.mulf %48, %48 : vector<2x128xf32>
    %50 = tpu.concatenate %48, %49 in 1 : vector<2x128xf32>, vector<2x128xf32> -> vector<2x256xf32>
    %cst_25 = arith.constant dense<0.000000e+00> : vector<256xf32>
    %51 = vector.multi_reduction <add>, %50, %cst_25 [0] : vector<2x256xf32> to vector<256xf32>
    %52 = vector.shape_cast %51 : vector<256xf32> to vector<1x256xf32>
    %cst_26 = arith.constant 5.000000e-01 : f32
    %53 = vector.broadcast %cst_26 : f32 to vector<1x256xf32>
    %54 = arith.mulf %52, %53 : vector<1x256xf32>
    %55 = vector.extract_strided_slice %54 {offsets = [0, 0], sizes = [1, 128], strides = [1, 1]} : vector<1x256xf32> to vector<1x128xf32>
    %56 = vector.extract_strided_slice %54 {offsets = [0, 128], sizes = [1, 128], strides = [1, 1]} : vector<1x256xf32> to vector<1x128xf32>
    %57 = arith.mulf %55, %55 : vector<1x128xf32>
    %58 = arith.subf %56, %57 : vector<1x128xf32>
    %cst_27 = arith.constant 0.000000e+00 : f32
    %59 = vector.broadcast %cst_27 : f32 to vector<1x128xf32>
    %60 = arith.maximumf %58, %59 : vector<1x128xf32>
    %61 = vector.broadcast %55 : vector<1x128xf32> to vector<2x128xf32>
    %62 = arith.subf %48, %61 : vector<2x128xf32>
    %cst_28 = arith.constant 9.99999974E-6 : f32
    %63 = vector.broadcast %cst_28 : f32 to vector<1x128xf32>
    %64 = arith.addf %60, %63 : vector<1x128xf32>
    %65 = math.rsqrt %64 : vector<1x128xf32>
    %66 = vector.broadcast %65 : vector<1x128xf32> to vector<2x128xf32>
    %67 = arith.mulf %62, %66 : vector<2x128xf32>
    %c0_i32_29 = arith.constant 0 : i32
    %68 = tpu.memref_slice %arg16[%c0_i32_29] : memref<2x!tpu.dma_semaphore, #tpu.memory_space<semaphore_mem>> -> memref<1x!tpu.dma_semaphore, #tpu.memory_space<semaphore_mem>>
    %69 = tpu.memref_squeeze %68 : memref<1x!tpu.dma_semaphore, #tpu.memory_space<semaphore_mem>> -> memref<!tpu.dma_semaphore, #tpu.memory_space<semaphore_mem>>
    tpu.wait_dma2 semaphore(%69 : memref<!tpu.dma_semaphore, #tpu.memory_space<semaphore_mem>>) src(%arg9 : memref<8x128x128xbf16, #tpu.memory_space<any>>) dst(%arg14 : memref<8x128x128xbf16, #tpu.memory_space<vmem>>)
    %c0_30 = arith.constant 0 : index
    %c0_31 = arith.constant 0 : index
    %c0_32 = arith.constant 0 : index
    %70 = vector.load %arg14[%c0_30, %c0_31, %c0_32] : memref<8x128x128xbf16, #tpu.memory_space<vmem>>, vector<1x128x128xbf16>
    %71 = vector.shape_cast %70 : vector<1x128x128xbf16> to vector<128x128xbf16>
    %72 = arith.truncf %67 : vector<2x128xf32> to vector<2x128xbf16>
    %cst_33 = arith.constant dense<0.000000e+00> : vector<2x128xf32>
    %73 = tpu.matmul %72, %71, %cst_33 {dimension_numbers = #tpu.dot_dimension_numbers<[1], [0], [0], [1], [0, 0, 1, 1], [], []>} : vector<2x128xbf16>, vector<128x128xbf16>, vector<2x128xf32> -> vector<2x128xf32>
    %74 = vector.extract_strided_slice %21 {offsets = [0, 0], sizes = [2, 128], strides = [1, 1]} : vector<2x1408xf32> to vector<2x128xf32>
    %75 = arith.addf %73, %74 : vector<2x128xf32>
    %cst_34 = arith.constant 0.000000e+00 : f32
    %76 = vector.broadcast %cst_34 : f32 to vector<2x128xf32>
    %77 = arith.cmpf ogt, %75, %76 : vector<2x128xf32>
    %cst_35 = arith.constant 2.000000e-01 : f32
    %78 = vector.broadcast %cst_35 : f32 to vector<2x128xf32>
    %79 = arith.mulf %78, %75 : vector<2x128xf32>
    %80 = arith.select %77, %75, %79 : vector<2x128xi1>, vector<2x128xf32>
    %81 = arith.mulf %80, %80 : vector<2x128xf32>
    %82 = tpu.concatenate %80, %81 in 1 : vector<2x128xf32>, vector<2x128xf32> -> vector<2x256xf32>
    %cst_36 = arith.constant dense<0.000000e+00> : vector<256xf32>
    %83 = vector.multi_reduction <add>, %82, %cst_36 [0] : vector<2x256xf32> to vector<256xf32>
    %84 = vector.shape_cast %83 : vector<256xf32> to vector<1x256xf32>
    %cst_37 = arith.constant 5.000000e-01 : f32
    %85 = vector.broadcast %cst_37 : f32 to vector<1x256xf32>
    %86 = arith.mulf %84, %85 : vector<1x256xf32>
    %87 = vector.extract_strided_slice %86 {offsets = [0, 0], sizes = [1, 128], strides = [1, 1]} : vector<1x256xf32> to vector<1x128xf32>
    %88 = vector.extract_strided_slice %86 {offsets = [0, 128], sizes = [1, 128], strides = [1, 1]} : vector<1x256xf32> to vector<1x128xf32>
    %89 = arith.mulf %87, %87 : vector<1x128xf32>
    %90 = arith.subf %88, %89 : vector<1x128xf32>
    %cst_38 = arith.constant 0.000000e+00 : f32
    %91 = vector.broadcast %cst_38 : f32 to vector<1x128xf32>
    %92 = arith.maximumf %90, %91 : vector<1x128xf32>
    %93 = vector.broadcast %87 : vector<1x128xf32> to vector<2x128xf32>
    %94 = arith.subf %80, %93 : vector<2x128xf32>
    %cst_39 = arith.constant 9.99999974E-6 : f32
    %95 = vector.broadcast %cst_39 : f32 to vector<1x128xf32>
    %96 = arith.addf %92, %95 : vector<1x128xf32>
    %97 = math.rsqrt %96 : vector<1x128xf32>
    %98 = vector.broadcast %97 : vector<1x128xf32> to vector<2x128xf32>
    %99 = arith.mulf %94, %98 : vector<2x128xf32>
    %c1 = arith.constant 1 : index
    %c0_40 = arith.constant 0 : index
    %c0_41 = arith.constant 0 : index
    %100 = vector.load %arg14[%c1, %c0_40, %c0_41] : memref<8x128x128xbf16, #tpu.memory_space<vmem>>, vector<1x128x128xbf16>
    %101 = vector.shape_cast %100 : vector<1x128x128xbf16> to vector<128x128xbf16>
    %102 = arith.truncf %99 : vector<2x128xf32> to vector<2x128xbf16>
    %cst_42 = arith.constant dense<0.000000e+00> : vector<2x128xf32>
    %103 = tpu.matmul %102, %101, %cst_42 {dimension_numbers = #tpu.dot_dimension_numbers<[1], [0], [0], [1], [0, 0, 1, 1], [], []>} : vector<2x128xbf16>, vector<128x128xbf16>, vector<2x128xf32> -> vector<2x128xf32>
    %104 = vector.extract_strided_slice %21 {offsets = [0, 128], sizes = [2, 128], strides = [1, 1]} : vector<2x1408xf32> to vector<2x128xf32>
    %105 = arith.addf %103, %104 : vector<2x128xf32>
    %cst_43 = arith.constant 0.000000e+00 : f32
    %106 = vector.broadcast %cst_43 : f32 to vector<2x128xf32>
    %107 = arith.cmpf ogt, %105, %106 : vector<2x128xf32>
    %cst_44 = arith.constant 2.000000e-01 : f32
    %108 = vector.broadcast %cst_44 : f32 to vector<2x128xf32>
    %109 = arith.mulf %108, %105 : vector<2x128xf32>
    %110 = arith.select %107, %105, %109 : vector<2x128xi1>, vector<2x128xf32>
    %111 = arith.mulf %110, %110 : vector<2x128xf32>
    %112 = tpu.concatenate %110, %111 in 1 : vector<2x128xf32>, vector<2x128xf32> -> vector<2x256xf32>
    %cst_45 = arith.constant dense<0.000000e+00> : vector<256xf32>
    %113 = vector.multi_reduction <add>, %112, %cst_45 [0] : vector<2x256xf32> to vector<256xf32>
    %114 = vector.shape_cast %113 : vector<256xf32> to vector<1x256xf32>
    %cst_46 = arith.constant 5.000000e-01 : f32
    %115 = vector.broadcast %cst_46 : f32 to vector<1x256xf32>
    %116 = arith.mulf %114, %115 : vector<1x256xf32>
    %117 = vector.extract_strided_slice %116 {offsets = [0, 0], sizes = [1, 128], strides = [1, 1]} : vector<1x256xf32> to vector<1x128xf32>
    %118 = vector.extract_strided_slice %116 {offsets = [0, 128], sizes = [1, 128], strides = [1, 1]} : vector<1x256xf32> to vector<1x128xf32>
    %119 = arith.mulf %117, %117 : vector<1x128xf32>
    %120 = arith.subf %118, %119 : vector<1x128xf32>
    %cst_47 = arith.constant 0.000000e+00 : f32
    %121 = vector.broadcast %cst_47 : f32 to vector<1x128xf32>
    %122 = arith.maximumf %120, %121 : vector<1x128xf32>
    %123 = vector.broadcast %117 : vector<1x128xf32> to vector<2x128xf32>
    %124 = arith.subf %110, %123 : vector<2x128xf32>
    %cst_48 = arith.constant 9.99999974E-6 : f32
    %125 = vector.broadcast %cst_48 : f32 to vector<1x128xf32>
    %126 = arith.addf %122, %125 : vector<1x128xf32>
    %127 = math.rsqrt %126 : vector<1x128xf32>
    %128 = vector.broadcast %127 : vector<1x128xf32> to vector<2x128xf32>
    %129 = arith.mulf %124, %128 : vector<2x128xf32>
    %c2 = arith.constant 2 : index
    %c0_49 = arith.constant 0 : index
    %c0_50 = arith.constant 0 : index
    %130 = vector.load %arg14[%c2, %c0_49, %c0_50] : memref<8x128x128xbf16, #tpu.memory_space<vmem>>, vector<1x128x128xbf16>
    %131 = vector.shape_cast %130 : vector<1x128x128xbf16> to vector<128x128xbf16>
    %132 = arith.truncf %129 : vector<2x128xf32> to vector<2x128xbf16>
    %cst_51 = arith.constant dense<0.000000e+00> : vector<2x128xf32>
    %133 = tpu.matmul %132, %131, %cst_51 {dimension_numbers = #tpu.dot_dimension_numbers<[1], [0], [0], [1], [0, 0, 1, 1], [], []>} : vector<2x128xbf16>, vector<128x128xbf16>, vector<2x128xf32> -> vector<2x128xf32>
    %134 = vector.extract_strided_slice %21 {offsets = [0, 256], sizes = [2, 128], strides = [1, 1]} : vector<2x1408xf32> to vector<2x128xf32>
    %135 = arith.addf %133, %134 : vector<2x128xf32>
    %cst_52 = arith.constant 0.000000e+00 : f32
    %136 = vector.broadcast %cst_52 : f32 to vector<2x128xf32>
    %137 = arith.cmpf ogt, %135, %136 : vector<2x128xf32>
    %cst_53 = arith.constant 2.000000e-01 : f32
    %138 = vector.broadcast %cst_53 : f32 to vector<2x128xf32>
    %139 = arith.mulf %138, %135 : vector<2x128xf32>
    %140 = arith.select %137, %135, %139 : vector<2x128xi1>, vector<2x128xf32>
    %141 = arith.mulf %140, %140 : vector<2x128xf32>
    %142 = tpu.concatenate %140, %141 in 1 : vector<2x128xf32>, vector<2x128xf32> -> vector<2x256xf32>
    %cst_54 = arith.constant dense<0.000000e+00> : vector<256xf32>
    %143 = vector.multi_reduction <add>, %142, %cst_54 [0] : vector<2x256xf32> to vector<256xf32>
    %144 = vector.shape_cast %143 : vector<256xf32> to vector<1x256xf32>
    %cst_55 = arith.constant 5.000000e-01 : f32
    %145 = vector.broadcast %cst_55 : f32 to vector<1x256xf32>
    %146 = arith.mulf %144, %145 : vector<1x256xf32>
    %147 = vector.extract_strided_slice %146 {offsets = [0, 0], sizes = [1, 128], strides = [1, 1]} : vector<1x256xf32> to vector<1x128xf32>
    %148 = vector.extract_strided_slice %146 {offsets = [0, 128], sizes = [1, 128], strides = [1, 1]} : vector<1x256xf32> to vector<1x128xf32>
    %149 = arith.mulf %147, %147 : vector<1x128xf32>
    %150 = arith.subf %148, %149 : vector<1x128xf32>
    %cst_56 = arith.constant 0.000000e+00 : f32
    %151 = vector.broadcast %cst_56 : f32 to vector<1x128xf32>
    %152 = arith.maximumf %150, %151 : vector<1x128xf32>
    %153 = vector.broadcast %147 : vector<1x128xf32> to vector<2x128xf32>
    %154 = arith.subf %140, %153 : vector<2x128xf32>
    %cst_57 = arith.constant 9.99999974E-6 : f32
    %155 = vector.broadcast %cst_57 : f32 to vector<1x128xf32>
    %156 = arith.addf %152, %155 : vector<1x128xf32>
    %157 = math.rsqrt %156 : vector<1x128xf32>
    %158 = vector.broadcast %157 : vector<1x128xf32> to vector<2x128xf32>
    %159 = arith.mulf %154, %158 : vector<2x128xf32>
    %c3 = arith.constant 3 : index
    %c0_58 = arith.constant 0 : index
    %c0_59 = arith.constant 0 : index
    %160 = vector.load %arg14[%c3, %c0_58, %c0_59] : memref<8x128x128xbf16, #tpu.memory_space<vmem>>, vector<1x128x128xbf16>
    %161 = vector.shape_cast %160 : vector<1x128x128xbf16> to vector<128x128xbf16>
    %162 = arith.truncf %159 : vector<2x128xf32> to vector<2x128xbf16>
    %cst_60 = arith.constant dense<0.000000e+00> : vector<2x128xf32>
    %163 = tpu.matmul %162, %161, %cst_60 {dimension_numbers = #tpu.dot_dimension_numbers<[1], [0], [0], [1], [0, 0, 1, 1], [], []>} : vector<2x128xbf16>, vector<128x128xbf16>, vector<2x128xf32> -> vector<2x128xf32>
    %164 = vector.extract_strided_slice %21 {offsets = [0, 384], sizes = [2, 128], strides = [1, 1]} : vector<2x1408xf32> to vector<2x128xf32>
    %165 = arith.addf %163, %164 : vector<2x128xf32>
    %cst_61 = arith.constant 0.000000e+00 : f32
    %166 = vector.broadcast %cst_61 : f32 to vector<2x128xf32>
    %167 = arith.cmpf ogt, %165, %166 : vector<2x128xf32>
    %cst_62 = arith.constant 2.000000e-01 : f32
    %168 = vector.broadcast %cst_62 : f32 to vector<2x128xf32>
    %169 = arith.mulf %168, %165 : vector<2x128xf32>
    %170 = arith.select %167, %165, %169 : vector<2x128xi1>, vector<2x128xf32>
    %171 = arith.mulf %170, %170 : vector<2x128xf32>
    %172 = tpu.concatenate %170, %171 in 1 : vector<2x128xf32>, vector<2x128xf32> -> vector<2x256xf32>
    %cst_63 = arith.constant dense<0.000000e+00> : vector<256xf32>
    %173 = vector.multi_reduction <add>, %172, %cst_63 [0] : vector<2x256xf32> to vector<256xf32>
    %174 = vector.shape_cast %173 : vector<256xf32> to vector<1x256xf32>
    %cst_64 = arith.constant 5.000000e-01 : f32
    %175 = vector.broadcast %cst_64 : f32 to vector<1x256xf32>
    %176 = arith.mulf %174, %175 : vector<1x256xf32>
    %177 = vector.extract_strided_slice %176 {offsets = [0, 0], sizes = [1, 128], strides = [1, 1]} : vector<1x256xf32> to vector<1x128xf32>
    %178 = vector.extract_strided_slice %176 {offsets = [0, 128], sizes = [1, 128], strides = [1, 1]} : vector<1x256xf32> to vector<1x128xf32>
    %179 = arith.mulf %177, %177 : vector<1x128xf32>
    %180 = arith.subf %178, %179 : vector<1x128xf32>
    %cst_65 = arith.constant 0.000000e+00 : f32
    %181 = vector.broadcast %cst_65 : f32 to vector<1x128xf32>
    %182 = arith.maximumf %180, %181 : vector<1x128xf32>
    %183 = vector.broadcast %177 : vector<1x128xf32> to vector<2x128xf32>
    %184 = arith.subf %170, %183 : vector<2x128xf32>
    %cst_66 = arith.constant 9.99999974E-6 : f32
    %185 = vector.broadcast %cst_66 : f32 to vector<1x128xf32>
    %186 = arith.addf %182, %185 : vector<1x128xf32>
    %187 = math.rsqrt %186 : vector<1x128xf32>
    %188 = vector.broadcast %187 : vector<1x128xf32> to vector<2x128xf32>
    %189 = arith.mulf %184, %188 : vector<2x128xf32>
    %c4 = arith.constant 4 : index
    %c0_67 = arith.constant 0 : index
    %c0_68 = arith.constant 0 : index
    %190 = vector.load %arg14[%c4, %c0_67, %c0_68] : memref<8x128x128xbf16, #tpu.memory_space<vmem>>, vector<1x128x128xbf16>
    %191 = vector.shape_cast %190 : vector<1x128x128xbf16> to vector<128x128xbf16>
    %192 = arith.truncf %189 : vector<2x128xf32> to vector<2x128xbf16>
    %cst_69 = arith.constant dense<0.000000e+00> : vector<2x128xf32>
    %193 = tpu.matmul %192, %191, %cst_69 {dimension_numbers = #tpu.dot_dimension_numbers<[1], [0], [0], [1], [0, 0, 1, 1], [], []>} : vector<2x128xbf16>, vector<128x128xbf16>, vector<2x128xf32> -> vector<2x128xf32>
    %194 = vector.extract_strided_slice %21 {offsets = [0, 512], sizes = [2, 128], strides = [1, 1]} : vector<2x1408xf32> to vector<2x128xf32>
    %195 = arith.addf %193, %194 : vector<2x128xf32>
    %cst_70 = arith.constant 0.000000e+00 : f32
    %196 = vector.broadcast %cst_70 : f32 to vector<2x128xf32>
    %197 = arith.cmpf ogt, %195, %196 : vector<2x128xf32>
    %cst_71 = arith.constant 2.000000e-01 : f32
    %198 = vector.broadcast %cst_71 : f32 to vector<2x128xf32>
    %199 = arith.mulf %198, %195 : vector<2x128xf32>
    %200 = arith.select %197, %195, %199 : vector<2x128xi1>, vector<2x128xf32>
    %201 = arith.mulf %200, %200 : vector<2x128xf32>
    %202 = tpu.concatenate %200, %201 in 1 : vector<2x128xf32>, vector<2x128xf32> -> vector<2x256xf32>
    %cst_72 = arith.constant dense<0.000000e+00> : vector<256xf32>
    %203 = vector.multi_reduction <add>, %202, %cst_72 [0] : vector<2x256xf32> to vector<256xf32>
    %204 = vector.shape_cast %203 : vector<256xf32> to vector<1x256xf32>
    %cst_73 = arith.constant 5.000000e-01 : f32
    %205 = vector.broadcast %cst_73 : f32 to vector<1x256xf32>
    %206 = arith.mulf %204, %205 : vector<1x256xf32>
    %207 = vector.extract_strided_slice %206 {offsets = [0, 0], sizes = [1, 128], strides = [1, 1]} : vector<1x256xf32> to vector<1x128xf32>
    %208 = vector.extract_strided_slice %206 {offsets = [0, 128], sizes = [1, 128], strides = [1, 1]} : vector<1x256xf32> to vector<1x128xf32>
    %209 = arith.mulf %207, %207 : vector<1x128xf32>
    %210 = arith.subf %208, %209 : vector<1x128xf32>
    %cst_74 = arith.constant 0.000000e+00 : f32
    %211 = vector.broadcast %cst_74 : f32 to vector<1x128xf32>
    %212 = arith.maximumf %210, %211 : vector<1x128xf32>
    %213 = vector.broadcast %207 : vector<1x128xf32> to vector<2x128xf32>
    %214 = arith.subf %200, %213 : vector<2x128xf32>
    %cst_75 = arith.constant 9.99999974E-6 : f32
    %215 = vector.broadcast %cst_75 : f32 to vector<1x128xf32>
    %216 = arith.addf %212, %215 : vector<1x128xf32>
    %217 = math.rsqrt %216 : vector<1x128xf32>
    %218 = vector.broadcast %217 : vector<1x128xf32> to vector<2x128xf32>
    %219 = arith.mulf %214, %218 : vector<2x128xf32>
    %c5 = arith.constant 5 : index
    %c0_76 = arith.constant 0 : index
    %c0_77 = arith.constant 0 : index
    %220 = vector.load %arg14[%c5, %c0_76, %c0_77] : memref<8x128x128xbf16, #tpu.memory_space<vmem>>, vector<1x128x128xbf16>
    %221 = vector.shape_cast %220 : vector<1x128x128xbf16> to vector<128x128xbf16>
    %222 = arith.truncf %219 : vector<2x128xf32> to vector<2x128xbf16>
    %cst_78 = arith.constant dense<0.000000e+00> : vector<2x128xf32>
    %223 = tpu.matmul %222, %221, %cst_78 {dimension_numbers = #tpu.dot_dimension_numbers<[1], [0], [0], [1], [0, 0, 1, 1], [], []>} : vector<2x128xbf16>, vector<128x128xbf16>, vector<2x128xf32> -> vector<2x128xf32>
    %224 = vector.extract_strided_slice %21 {offsets = [0, 640], sizes = [2, 128], strides = [1, 1]} : vector<2x1408xf32> to vector<2x128xf32>
    %225 = arith.addf %223, %224 : vector<2x128xf32>
    %cst_79 = arith.constant 0.000000e+00 : f32
    %226 = vector.broadcast %cst_79 : f32 to vector<2x128xf32>
    %227 = arith.cmpf ogt, %225, %226 : vector<2x128xf32>
    %cst_80 = arith.constant 2.000000e-01 : f32
    %228 = vector.broadcast %cst_80 : f32 to vector<2x128xf32>
    %229 = arith.mulf %228, %225 : vector<2x128xf32>
    %230 = arith.select %227, %225, %229 : vector<2x128xi1>, vector<2x128xf32>
    %231 = arith.mulf %230, %230 : vector<2x128xf32>
    %232 = tpu.concatenate %230, %231 in 1 : vector<2x128xf32>, vector<2x128xf32> -> vector<2x256xf32>
    %cst_81 = arith.constant dense<0.000000e+00> : vector<256xf32>
    %233 = vector.multi_reduction <add>, %232, %cst_81 [0] : vector<2x256xf32> to vector<256xf32>
    %234 = vector.shape_cast %233 : vector<256xf32> to vector<1x256xf32>
    %cst_82 = arith.constant 5.000000e-01 : f32
    %235 = vector.broadcast %cst_82 : f32 to vector<1x256xf32>
    %236 = arith.mulf %234, %235 : vector<1x256xf32>
    %237 = vector.extract_strided_slice %236 {offsets = [0, 0], sizes = [1, 128], strides = [1, 1]} : vector<1x256xf32> to vector<1x128xf32>
    %238 = vector.extract_strided_slice %236 {offsets = [0, 128], sizes = [1, 128], strides = [1, 1]} : vector<1x256xf32> to vector<1x128xf32>
    %239 = arith.mulf %237, %237 : vector<1x128xf32>
    %240 = arith.subf %238, %239 : vector<1x128xf32>
    %cst_83 = arith.constant 0.000000e+00 : f32
    %241 = vector.broadcast %cst_83 : f32 to vector<1x128xf32>
    %242 = arith.maximumf %240, %241 : vector<1x128xf32>
    %243 = vector.broadcast %237 : vector<1x128xf32> to vector<2x128xf32>
    %244 = arith.subf %230, %243 : vector<2x128xf32>
    %cst_84 = arith.constant 9.99999974E-6 : f32
    %245 = vector.broadcast %cst_84 : f32 to vector<1x128xf32>
    %246 = arith.addf %242, %245 : vector<1x128xf32>
    %247 = math.rsqrt %246 : vector<1x128xf32>
    %248 = vector.broadcast %247 : vector<1x128xf32> to vector<2x128xf32>
    %249 = arith.mulf %244, %248 : vector<2x128xf32>
    %c6 = arith.constant 6 : index
    %c0_85 = arith.constant 0 : index
    %c0_86 = arith.constant 0 : index
    %250 = vector.load %arg14[%c6, %c0_85, %c0_86] : memref<8x128x128xbf16, #tpu.memory_space<vmem>>, vector<1x128x128xbf16>
    %251 = vector.shape_cast %250 : vector<1x128x128xbf16> to vector<128x128xbf16>
    %252 = arith.truncf %249 : vector<2x128xf32> to vector<2x128xbf16>
    %cst_87 = arith.constant dense<0.000000e+00> : vector<2x128xf32>
    %253 = tpu.matmul %252, %251, %cst_87 {dimension_numbers = #tpu.dot_dimension_numbers<[1], [0], [0], [1], [0, 0, 1, 1], [], []>} : vector<2x128xbf16>, vector<128x128xbf16>, vector<2x128xf32> -> vector<2x128xf32>
    %254 = vector.extract_strided_slice %21 {offsets = [0, 768], sizes = [2, 128], strides = [1, 1]} : vector<2x1408xf32> to vector<2x128xf32>
    %255 = arith.addf %253, %254 : vector<2x128xf32>
    %cst_88 = arith.constant 0.000000e+00 : f32
    %256 = vector.broadcast %cst_88 : f32 to vector<2x128xf32>
    %257 = arith.cmpf ogt, %255, %256 : vector<2x128xf32>
    %cst_89 = arith.constant 2.000000e-01 : f32
    %258 = vector.broadcast %cst_89 : f32 to vector<2x128xf32>
    %259 = arith.mulf %258, %255 : vector<2x128xf32>
    %260 = arith.select %257, %255, %259 : vector<2x128xi1>, vector<2x128xf32>
    %261 = arith.mulf %260, %260 : vector<2x128xf32>
    %262 = tpu.concatenate %260, %261 in 1 : vector<2x128xf32>, vector<2x128xf32> -> vector<2x256xf32>
    %cst_90 = arith.constant dense<0.000000e+00> : vector<256xf32>
    %263 = vector.multi_reduction <add>, %262, %cst_90 [0] : vector<2x256xf32> to vector<256xf32>
    %264 = vector.shape_cast %263 : vector<256xf32> to vector<1x256xf32>
    %cst_91 = arith.constant 5.000000e-01 : f32
    %265 = vector.broadcast %cst_91 : f32 to vector<1x256xf32>
    %266 = arith.mulf %264, %265 : vector<1x256xf32>
    %267 = vector.extract_strided_slice %266 {offsets = [0, 0], sizes = [1, 128], strides = [1, 1]} : vector<1x256xf32> to vector<1x128xf32>
    %268 = vector.extract_strided_slice %266 {offsets = [0, 128], sizes = [1, 128], strides = [1, 1]} : vector<1x256xf32> to vector<1x128xf32>
    %269 = arith.mulf %267, %267 : vector<1x128xf32>
    %270 = arith.subf %268, %269 : vector<1x128xf32>
    %cst_92 = arith.constant 0.000000e+00 : f32
    %271 = vector.broadcast %cst_92 : f32 to vector<1x128xf32>
    %272 = arith.maximumf %270, %271 : vector<1x128xf32>
    %273 = vector.broadcast %267 : vector<1x128xf32> to vector<2x128xf32>
    %274 = arith.subf %260, %273 : vector<2x128xf32>
    %cst_93 = arith.constant 9.99999974E-6 : f32
    %275 = vector.broadcast %cst_93 : f32 to vector<1x128xf32>
    %276 = arith.addf %272, %275 : vector<1x128xf32>
    %277 = math.rsqrt %276 : vector<1x128xf32>
    %278 = vector.broadcast %277 : vector<1x128xf32> to vector<2x128xf32>
    %279 = arith.mulf %274, %278 : vector<2x128xf32>
    %c7 = arith.constant 7 : index
    %c0_94 = arith.constant 0 : index
    %c0_95 = arith.constant 0 : index
    %280 = vector.load %arg14[%c7, %c0_94, %c0_95] : memref<8x128x128xbf16, #tpu.memory_space<vmem>>, vector<1x128x128xbf16>
    %281 = vector.shape_cast %280 : vector<1x128x128xbf16> to vector<128x128xbf16>
    %282 = arith.truncf %279 : vector<2x128xf32> to vector<2x128xbf16>
    %cst_96 = arith.constant dense<0.000000e+00> : vector<2x128xf32>
    %283 = tpu.matmul %282, %281, %cst_96 {dimension_numbers = #tpu.dot_dimension_numbers<[1], [0], [0], [1], [0, 0, 1, 1], [], []>} : vector<2x128xbf16>, vector<128x128xbf16>, vector<2x128xf32> -> vector<2x128xf32>
    %284 = vector.extract_strided_slice %21 {offsets = [0, 896], sizes = [2, 128], strides = [1, 1]} : vector<2x1408xf32> to vector<2x128xf32>
    %285 = arith.addf %283, %284 : vector<2x128xf32>
    %cst_97 = arith.constant 0.000000e+00 : f32
    %286 = vector.broadcast %cst_97 : f32 to vector<2x128xf32>
    %287 = arith.cmpf ogt, %285, %286 : vector<2x128xf32>
    %cst_98 = arith.constant 2.000000e-01 : f32
    %288 = vector.broadcast %cst_98 : f32 to vector<2x128xf32>
    %289 = arith.mulf %288, %285 : vector<2x128xf32>
    %290 = arith.select %287, %285, %289 : vector<2x128xi1>, vector<2x128xf32>
    %291 = arith.mulf %290, %290 : vector<2x128xf32>
    %292 = tpu.concatenate %290, %291 in 1 : vector<2x128xf32>, vector<2x128xf32> -> vector<2x256xf32>
    %cst_99 = arith.constant dense<0.000000e+00> : vector<256xf32>
    %293 = vector.multi_reduction <add>, %292, %cst_99 [0] : vector<2x256xf32> to vector<256xf32>
    %294 = vector.shape_cast %293 : vector<256xf32> to vector<1x256xf32>
    %cst_100 = arith.constant 5.000000e-01 : f32
    %295 = vector.broadcast %cst_100 : f32 to vector<1x256xf32>
    %296 = arith.mulf %294, %295 : vector<1x256xf32>
    %297 = vector.extract_strided_slice %296 {offsets = [0, 0], sizes = [1, 128], strides = [1, 1]} : vector<1x256xf32> to vector<1x128xf32>
    %298 = vector.extract_strided_slice %296 {offsets = [0, 128], sizes = [1, 128], strides = [1, 1]} : vector<1x256xf32> to vector<1x128xf32>
    %299 = arith.mulf %297, %297 : vector<1x128xf32>
    %300 = arith.subf %298, %299 : vector<1x128xf32>
    %cst_101 = arith.constant 0.000000e+00 : f32
    %301 = vector.broadcast %cst_101 : f32 to vector<1x128xf32>
    %302 = arith.maximumf %300, %301 : vector<1x128xf32>
    %303 = vector.broadcast %297 : vector<1x128xf32> to vector<2x128xf32>
    %304 = arith.subf %290, %303 : vector<2x128xf32>
    %cst_102 = arith.constant 9.99999974E-6 : f32
    %305 = vector.broadcast %cst_102 : f32 to vector<1x128xf32>
    %306 = arith.addf %302, %305 : vector<1x128xf32>
    %307 = math.rsqrt %306 : vector<1x128xf32>
    %308 = vector.broadcast %307 : vector<1x128xf32> to vector<2x128xf32>
    %309 = arith.mulf %304, %308 : vector<2x128xf32>
    %c1_i32_103 = arith.constant 1 : i32
    %310 = tpu.memref_slice %arg16[%c1_i32_103] : memref<2x!tpu.dma_semaphore, #tpu.memory_space<semaphore_mem>> -> memref<1x!tpu.dma_semaphore, #tpu.memory_space<semaphore_mem>>
    %311 = tpu.memref_squeeze %310 : memref<1x!tpu.dma_semaphore, #tpu.memory_space<semaphore_mem>> -> memref<!tpu.dma_semaphore, #tpu.memory_space<semaphore_mem>>
    tpu.wait_dma2 semaphore(%311 : memref<!tpu.dma_semaphore, #tpu.memory_space<semaphore_mem>>) src(%arg10 : memref<128x384xbf16, #tpu.memory_space<any>>) dst(%arg15 : memref<128x384xbf16, #tpu.memory_space<vmem>>)
    %c0_104 = arith.constant 0 : index
    %c0_105 = arith.constant 0 : index
    %312 = vector.load %arg15[%c0_104, %c0_105] : memref<128x384xbf16, #tpu.memory_space<vmem>>, vector<128x384xbf16>
    %313 = arith.truncf %309 : vector<2x128xf32> to vector<2x128xbf16>
    %cst_106 = arith.constant dense<0.000000e+00> : vector<2x384xf32>
    %314 = tpu.matmul %313, %312, %cst_106 {dimension_numbers = #tpu.dot_dimension_numbers<[1], [0], [0], [1], [0, 0, 1, 1], [], []>} : vector<2x128xbf16>, vector<128x384xbf16>, vector<2x384xf32> -> vector<2x384xf32>
    %315 = vector.extract_strided_slice %21 {offsets = [0, 1024], sizes = [2, 384], strides = [1, 1]} : vector<2x1408xf32> to vector<2x384xf32>
    %316 = arith.addf %314, %315 : vector<2x384xf32>
    %c0_107 = arith.constant 0 : index
    %c0_108 = arith.constant 0 : index
    %317 = vector.load %arg11[%c0_107, %c0_108] : memref<2x384xf32, #tpu.memory_space<vmem>>, vector<2x384xf32>
    tpu.vector_store %arg11[%c0_107, %c0_108], %316 {strides = array<i32>} : memref<2x384xf32, #tpu.memory_space<vmem>>, vector<2x384xf32>,
    %c0_109 = arith.constant 0 : index
    %c0_110 = arith.constant 0 : index
    %318 = vector.load %arg12[%c0_109, %c0_110] : memref<2x128xf32, #tpu.memory_space<vmem>>, vector<2x128xf32>
    tpu.vector_store %arg12[%c0_109, %c0_110], %19 {strides = array<i32>} : memref<2x128xf32, #tpu.memory_space<vmem>>, vector<2x128xf32>,
    %c0_111 = arith.constant 0 : index
    %c0_112 = arith.constant 0 : index
    %319 = vector.load %arg13[%c0_111, %c0_112] : memref<2x128xf32, #tpu.memory_space<vmem>>, vector<2x128xf32>
    tpu.vector_store %arg13[%c0_111, %c0_112], %20 {strides = array<i32>} : memref<2x128xf32, #tpu.memory_space<vmem>>, vector<2x128xf32>,
    return
  }
}

</mosaic_0001>

<bundles_post_ra>
// kernel: generator_forward.1
= control target key start
LH: loop header
LB: loop body
LE: loop exit
PB: predicated region body
PF: predicated region fallthrough
CT: control target
= control target key end

     0   :  { %19 = vsyncpa [#allocation6], 0  ;;  %s4368_s0 = inlined_call_operand.vmem [shape: f32[4,768], index: 0, kind: input, shape index: {}]   ;;  %s4369_s1 = inlined_call_operand.vmem [shape: f32[4,768], index: 1, kind: input, shape index: {}]   ;;  %s4370_s2 = inlined_call_operand.vmem [shape: f32[2,128], index: 2, kind: input, shape index: {}]   ;;  %s4371_s3 = inlined_call_operand.hbm [shape: bf16[768,128], index: 3, kind: input, shape index: {}]   ;;  %s4372_s4 = inlined_call_operand.vmem [shape: f32[1,128], index: 4, kind: input, shape index: {}]   ;;  %s4373_s5 = inlined_call_operand.hbm [shape: bf16[128,1664], index: 5, kind: input, shape index: {}]   ;;  %s4374_s6 = inlined_call_operand.hbm [shape: f32[1,1664], index: 6, kind: input, shape index: {}]   ;;  %s4375_s7 = inlined_call_operand.vmem [shape: bf16[128,128], index: 7, kind: input, shape index: {}]   ;;  %s4376_s8 = inlined_call_operand.vmem [shape: f32[1,128], index: 8, kind: input, shape index: {}]   ;;  %s4377_s9 = inlined_call_operand.hbm [shape: bf16[8,128,128], index: 9, kind: input, shape index: {}]   ;;  %s4378_s10 = inlined_call_operand.vmem [shape: bf16[128,384], index: 10, kind: input, shape index: {}]   ;;  %s4379_s11 = inlined_call_operand.hbm [shape: f32[2,384], index: 11, kind: output, shape index: {0}]   ;;  %s4380_s12 = inlined_call_operand.hbm [shape: f32[2,128], index: 12, kind: output, shape index: {1}]   ;;  %s4381_s13 = inlined_call_operand.hbm [shape: f32[2,128], index: 13, kind: output, shape index: {2}]  }
   0x1   :  { %20 = vsyncpa [#allocation9], 0 }
   0x2   :  { %21 = vsyncpa [#allocation7], 0 }
   0x3   :  { %22 = vsyncpa [#allocation13], 0  ;;  %s3817_s25 = smov [#allocation8]   ;;  %s3651_s29 = scalar_lea.hbm %s4373_s5, 13312 }
   0x4   :  { %s48_s26 = sshll.u32 %s3817_s25, 4  ;;  %p3652_p0 = scmp.ne.s32.totalorder %s4373_s5, %s3651_s29  ;;  %s49_s26 = int_to_ptr.vmem [resolvable:$true] %s48_s26 }
   0x5   :  { %p3655_p1 = scmp.lt.u32.totalorder %s3651_s29, %s4373_s5 }
   0x7   :  { %p3657_p2 = pnand %p3655_p1, %p3652_p0 }
   0x9   :  { %3660 = shalt.err (!%p3657_p2)
}
   0xa   :  { %s3661_s17 = scalar_lea.vmem %s49_s26, 13312  ;;  %p3666_p4 = scmp.lt.s32.totalorder %s49_s26, %s49_s26 }
   0xb   :  { %p3662_p3 = scmp.ne.s32.totalorder %s49_s26, %s3661_s17  ;;  %p3667_p5 = scmp.lt.s32.totalorder %s3661_s17, %s3661_s17 }
   0xd   :  { %p3668_p6 = por %p3667_p5, %p3666_p4 }
   0xf   :  { %p3669_p7 = pnand %p3668_p6, %p3662_p3 }
  0x11   :  { %3672 = shalt.err (!%p3669_p7)
}
  0x12   :  { %s3818_s18 = smov 832   ;;  %s3819_s19 = smov 52  }
  0x13   :  { %54 = dma.hbm_to_vmem [thread:$0]  %s4373_s5, 13312, %s49_s26, [#allocation9], %s3818_s18, %s3818_s18, %s3819_s19  }
  0x14   :  { %s3820_s22 = smov [#allocation5]   ;;  %s3673_s27 = scalar_lea.hbm %s4371_s3, 6144 }
  0x15   :  { %s34_s23 = sshll.u32 %s3820_s22, 4  ;;  %p3674_p8 = scmp.ne.s32.totalorder %s4371_s3, %s3673_s27  ;;  %s35_s23 = int_to_ptr.vmem [resolvable:$true] %s34_s23 }
  0x16   :  { %p3677_p9 = scmp.lt.u32.totalorder %s3673_s27, %s4371_s3 }
  0x18   :  { %p3679_p10 = pnand %p3677_p9, %p3674_p8 }
  0x1a   :  { %3682 = shalt.err (!%p3679_p10)
}
  0x1b   :  { %s3683_s15 = scalar_lea.vmem %s35_s23, 6144  ;;  %p3688_p12 = scmp.lt.s32.totalorder %s35_s23, %s35_s23 }
  0x1c   :  { %p3684_p11 = scmp.ne.s32.totalorder %s35_s23, %s3683_s15  ;;  %p3689_p13 = scmp.lt.s32.totalorder %s3683_s15, %s3683_s15 }
  0x1e   :  { %p3690_p0 = por %p3689_p13, %p3688_p12 }
  0x20   :  { %p3691_p1 = pnand %p3690_p0, %p3684_p11 }
  0x22   :  { %3694 = shalt.err (!%p3691_p1)
}
  0x23   :  { %s3821_s5 = smov 64   ;;  %s3822_s26 = smov 4  }
  0x24   :  { %40 = dma.hbm_to_vmem [thread:$0]  %s4371_s3, 6144, %s35_s23, [#allocation6], %s3821_s5, %s3821_s5, %s3822_s26  }
  0x25   :  { %s3823_s18 = smov [#allocation10]   ;;  %s3695_s22 = scalar_lea.hbm %s4374_s6, 208 }
  0x26   :  { %s61_s19 = sshll.u32 %s3823_s18, 4  ;;  %p3696_p2 = scmp.ne.s32.totalorder %s4374_s6, %s3695_s22  ;;  %s62_s19 = int_to_ptr.vmem [resolvable:$true] %s61_s19 }
  0x27   :  { %p3699_p3 = scmp.lt.u32.totalorder %s3695_s22, %s4374_s6 }
  0x29   :  { %p3701_p4 = pnand %p3699_p3, %p3696_p2 }
  0x2b   :  { %3704 = shalt.err (!%p3701_p4)
}
  0x2c   :  { %s3705_s29 = scalar_lea.vmem %s62_s19, 208  ;;  %s3709_s3 = scalar_lea.vmem %s62_s19, 224 }
  0x2d   :  { %p3706_p5 = scmp.ne.s32.totalorder %s62_s19, %s3705_s29  ;;  %p3710_p6 = scmp.lt.s32.totalorder %s62_s19, %s62_s19 }
  0x2e   :  { %p3711_p7 = scmp.lt.s32.totalorder %s3709_s3, %s3705_s29 }
  0x30   :  { %p3712_p8 = por %p3711_p7, %p3710_p6 }
  0x32   :  { %p3713_p9 = pnand %p3712_p8, %p3706_p5 }
  0x34   :  { %3716 = shalt.err (!%p3713_p9)
}
  0x35   :  { %64 = dma.hbm_to_vmem [thread:$0]  %s4374_s6, 208, %s62_s19, [#allocation9]  }
  0x36   :  { %3805 = dma.done.wait [#allocation6], 6144  }
  0x37   :  { %3806 = vsyncadd [#allocation6], 4294961152 }
  0x38   :  { %3807 = dma.done.wait [#allocation9], 13520  }
  0x39   :  { %3808 = vsyncadd [#allocation9], 4294953776  ;;  %s3824_s14 = smov [#allocation2]   ;;  %s3717_s16 = scalar_lea.hbm %s4377_s9, 8192 }
  0x3a   :  { %s86_s15 = sshll.u32 %s3824_s14, 4  ;;  %p3718_p10 = scmp.ne.s32.totalorder %s4377_s9, %s3717_s16  ;;  %s87_s15 = int_to_ptr.vmem [resolvable:$true] %s86_s15 }
  0x3b   :  { %p3721_p11 = scmp.lt.u32.totalorder %s3717_s16, %s4377_s9 }
  0x3d   :  { %p3723_p12 = pnand %p3721_p11, %p3718_p10 }
  0x3f   :  { %3726 = shalt.err (!%p3723_p12)  }
  0x40   :  { %s3727_s6 = scalar_lea.vmem %s87_s15, 8192  ;;  %p3732_p0 = scmp.lt.s32.totalorder %s87_s15, %s87_s15 }
  0x41   :  { %p3728_p13 = scmp.ne.s32.totalorder %s87_s15, %s3727_s6  ;;  %p3733_p1 = scmp.lt.s32.totalorder %s3727_s6, %s3727_s6 }
  0x43   :  { %p3734_p2 = por %p3733_p1, %p3732_p0 }
  0x45   :  { %p3735_p3 = pnand %p3734_p2, %p3728_p13 }
  0x47   :  { %3738 = shalt.err (!%p3735_p3)  }
  0x48   :  { %89 = dma.hbm_to_vmem [thread:$0]  %s4377_s9, 8192, %s87_s15, [#allocation4]  ;;  %v108_v0 = vld [vmem:[%s4378_s10] sm:$0xf]  ;;  %v110_v1 = vld [vmem:[%s4378_s10 + $0xc] sm:$0xf] }
  0x49   :  { %v112_v2 = vld [vmem:[%s4378_s10 + $0x4] sm:$0xf]  ;;  %109 = vst [vmem:[#allocation3] sm:$0xf] %v108_v0  ;;  %111 = vst [vmem:[#allocation3 + $0x4] sm:$0xf] %v110_v1 }
  0x4a   :  { %113 = vst [vmem:[#allocation3 + $0x8] sm:$0xf] %v112_v2  ;;  %v114_v3 = vld [vmem:[%s4378_s10 + $0x10] sm:$0xf]  ;;  %v116_v4 = vld [vmem:[%s4378_s10 + $0x8] sm:$0xf] }
  0x4b   :  { %v118_v5 = vld [vmem:[%s4378_s10 + $0x14] sm:$0xff]   ;;  %115 = vst [vmem:[#allocation3 + $0xc] sm:$0xf] %v114_v3  ;;  %117 = vst [vmem:[#allocation3 + $0x10] sm:$0xf] %v116_v4  ;;  %v130_v10 = vld [vmem:[%s4378_s10 + $0x2c] sm:$0xff]  }
  0x4c   :  { %119 = vst [vmem:[#allocation3 + $0x14] sm:$0xff] %v118_v5   ;;  %v122_v6 = vld [vmem:[%s4378_s10 + $0x24] sm:$0xf]  ;;  %v124_v7 = vld [vmem:[%s4378_s10 + $0x1c] sm:$0xf]  ;;  %131 = vst [vmem:[#allocation3 + $0x2c] sm:$0xff] %v130_v10  }
  0x4d   :  { %v126_v8 = vld [vmem:[%s4378_s10 + $0x28] sm:$0xf]  ;;  %123 = vst [vmem:[#allocation3 + $0x1c] sm:$0xf] %v122_v6  ;;  %125 = vst [vmem:[#allocation3 + $0x20] sm:$0xf] %v124_v7 }
  0x4e   :  { %127 = vst [vmem:[#allocation3 + $0x24] sm:$0xf] %v126_v8  ;;  %v128_v9 = vld [vmem:[%s4378_s10 + $0x20] sm:$0xf]  ;;  %v134_v11 = vld [vmem:[%s4378_s10 + $0x3c] sm:$0xf] }
  0x4f   :  { %129 = vst [vmem:[#allocation3 + $0x28] sm:$0xf] %v128_v9  ;;  %135 = vst [vmem:[#allocation3 + $0x34] sm:$0xf] %v134_v11  ;;  %v136_v12 = vld [vmem:[%s4378_s10 + $0x34] sm:$0xf] }
  0x50   :  { %v138_v13 = vld [vmem:[%s4378_s10 + $0x40] sm:$0xf]  ;;  %v140_v14 = vld [vmem:[%s4378_s10 + $0x38] sm:$0xf]  ;;  %137 = vst [vmem:[#allocation3 + $0x38] sm:$0xf] %v136_v12 }
  0x51   :  { %139 = vst [vmem:[#allocation3 + $0x3c] sm:$0xf] %v138_v13  ;;  %141 = vst [vmem:[#allocation3 + $0x40] sm:$0xf] %v140_v14  ;;  %v142_v15 = vld [vmem:[%s4378_s10 + $0x44] sm:$0xff]   ;;  %v154_v20 = vld [vmem:[%s4378_s10 + $0x5c] sm:$0xff]  }
  0x52   :  { %v146_v16 = vld [vmem:[%s4378_s10 + $0x54] sm:$0xf]  ;;  %v148_v17 = vld [vmem:[%s4378_s10 + $0x4c] sm:$0xf]  ;;  %143 = vst [vmem:[#allocation3 + $0x44] sm:$0xff] %v142_v15   ;;  %155 = vst [vmem:[#allocation3 + $0x5c] sm:$0xff] %v154_v20  }
  0x53   :  { %147 = vst [vmem:[#allocation3 + $0x4c] sm:$0xf] %v146_v16  ;;  %149 = vst [vmem:[#allocation3 + $0x50] sm:$0xf] %v148_v17  ;;  %v150_v18 = vld [vmem:[%s4378_s10 + $0x58] sm:$0xf] }
  0x54   :  { %v152_v19 = vld [vmem:[%s4378_s10 + $0x50] sm:$0xf]  ;;  %151 = vst [vmem:[#allocation3 + $0x54] sm:$0xf] %v150_v18  ;;  %v158_v21 = vld [vmem:[%s4378_s10 + $0x6c] sm:$0xf] }
  0x55   :  { %153 = vst [vmem:[#allocation3 + $0x58] sm:$0xf] %v152_v19  ;;  %v160_v22 = vld [vmem:[%s4378_s10 + $0x64] sm:$0xf]  ;;  %v162_v23 = vld [vmem:[%s4378_s10 + $0x70] sm:$0xf] }
  0x56   :  { %159 = vst [vmem:[#allocation3 + $0x64] sm:$0xf] %v158_v21  ;;  %161 = vst [vmem:[#allocation3 + $0x68] sm:$0xf] %v160_v22  ;;  %v164_v24 = vld [vmem:[%s4378_s10 + $0x68] sm:$0xf] }
  0x57   :  { %163 = vst [vmem:[#allocation3 + $0x6c] sm:$0xf] %v162_v23  ;;  %v166_v25 = vld [vmem:[%s4378_s10 + $0x74] sm:$0xff]   ;;  %v170_v26 = vld [vmem:[%s4378_s10 + $0x84] sm:$0xf]  ;;  %v178_v30 = vld [vmem:[%s4378_s10 + $0x8c] sm:$0xff]  }
  0x58   :  { %165 = vst [vmem:[#allocation3 + $0x70] sm:$0xf] %v164_v24  ;;  %167 = vst [vmem:[#allocation3 + $0x74] sm:$0xff] %v166_v25   ;;  %v172_v27 = vld [vmem:[%s4378_s10 + $0x7c] sm:$0xf]  ;;  %v190_v35 = vld [vmem:[%s4378_s10 + $0xa4] sm:$0xff]  }
  0x59   :  { %171 = vst [vmem:[#allocation3 + $0x7c] sm:$0xf] %v170_v26  ;;  %v174_v28 = vld [vmem:[%s4378_s10 + $0x88] sm:$0xf]  ;;  %v176_v29 = vld [vmem:[%s4378_s10 + $0x80] sm:$0xf] }
  0x5a   :  { %173 = vst [vmem:[#allocation3 + $0x80] sm:$0xf] %v172_v27  ;;  %175 = vst [vmem:[#allocation3 + $0x84] sm:$0xf] %v174_v28  ;;  %v182_v31 = vld [vmem:[%s4378_s10 + $0x9c] sm:$0xf] }
  0x5b   :  { %177 = vst [vmem:[#allocation3 + $0x88] sm:$0xf] %v176_v29  ;;  %v184_v32 = vld [vmem:[%s4378_s10 + $0x94] sm:$0xf]  ;;  %179 = vst [vmem:[#allocation3 + $0x8c] sm:$0xff] %v178_v30  }
  0x5c   :  { %183 = vst [vmem:[#allocation3 + $0x94] sm:$0xf] %v182_v31  ;;  %185 = vst [vmem:[#allocation3 + $0x98] sm:$0xf] %v184_v32  ;;  %v186_v33 = vld [vmem:[%s4378_s10 + $0xa0] sm:$0xf] }
  0x5d   :  { %v188_v34 = vld [vmem:[%s4378_s10 + $0x98] sm:$0xf]  ;;  %187 = vst [vmem:[#allocation3 + $0x9c] sm:$0xf] %v186_v33  ;;  %191 = vst [vmem:[#allocation3 + $0xa4] sm:$0xff] %v190_v35  }
  0x5e   :  { %189 = vst [vmem:[#allocation3 + $0xa0] sm:$0xf] %v188_v34  ;;  %v194_v36 = vld [vmem:[%s4378_s10 + $0xb4] sm:$0xf]  ;;  %v196_v37 = vld [vmem:[%s4378_s10 + $0xac] sm:$0xf] }
  0x5f   :  { %v198_v38 = vld [vmem:[%s4378_s10 + $0xb8] sm:$0xf]  ;;  %195 = vst [vmem:[#allocation3 + $0xac] sm:$0xf] %v194_v36  ;;  %197 = vst [vmem:[#allocation3 + $0xb0] sm:$0xf] %v196_v37 }
  0x60   :  { %199 = vst [vmem:[#allocation3 + $0xb4] sm:$0xf] %v198_v38  ;;  %v200_v39 = vld [vmem:[%s4378_s10 + $0xb0] sm:$0xf]  ;;  %v202_v40 = vld [vmem:[%s4378_s10 + $0xbc] sm:$0xf] }
  0x61   :  { %201 = vst [vmem:[#allocation3 + $0xb8] sm:$0xf] %v200_v39  ;;  %203 = vst [vmem:[#allocation3 + $0xbc] sm:$0xf] %v202_v40 }
  0x62   :  { %330 = vsyncadd [#allocation4 + $0x1], 3072  ;;  %v3421_v41 = vld [vmem:[#allocation5 + $0x40] sm:$0xff]   ;;  %v3425_v45 = vld [vmem:[#allocation5 + $0x48] sm:$0xff]   ;;  %vm3827_vm0 = vmmov 0   ;;  %vm1875_vm1 = vcmask 1041408  }
  0x63   :  { %v3422_v42 = vld [vmem:[#allocation5] sm:$0xff]   ;;  %3010 = vmatprep.subr.bf16.mxu0 %v3421_v41  ;;  %v3426_v46 = vld [vmem:[#allocation5 + $0x8] sm:$0xff]   ;;  %v3429_v49 = vld [vmem:[#allocation5 + $0x50] sm:$0xff]  }
  0x64   :  { %v3423_v43 = vld [vmem:[#allocation5 + $0xc0] sm:$0xff]   ;;  %3011 = vmatpush3.bf16.msra.mxu0 %v3422_v42  ;;  %v3427_v47 = vld [vmem:[#allocation5 + $0xc8] sm:$0xff]   ;;  %v3430_v50 = vld [vmem:[#allocation5 + $0x10] sm:$0xff]  }
  0x65   :  { %v3424_v44 = vld [vmem:[#allocation5 + $0x80] sm:$0xff]   ;;  %3032 = vmatprep.subr.bf16.mxu1 %v3423_v43  ;;  %3012 = vmatprep.subr.bf16.mxu0 %v3425_v45  ;;  %v3428_v48 = vld [vmem:[#allocation5 + $0x88] sm:$0xff]   ;;  %v3431_v51 = vld [vmem:[#allocation5 + $0xd0] sm:$0xff]  }
  0x66   :  { %3033 = vmatpush3.bf16.msra.mxu1 %v3424_v44  ;;  %v3432_v52 = vld [vmem:[#allocation5 + $0x90] sm:$0xff]   ;;  %v3433_v53 = vld [vmem:[#allocation5 + $0x58] sm:$0xff]   ;;  %v3437_v57 = vld [vmem:[#allocation5 + $0x60] sm:$0xff]  }
  0x67   :  { %3034 = vmatprep.subr.bf16.mxu1 %v3427_v47  ;;  %v3434_v54 = vld [vmem:[#allocation5 + $0x18] sm:$0xff]   ;;  %v3438_v58 = vld [vmem:[#allocation5 + $0x20] sm:$0xff]   ;;  %v3441_v61 = vld [vmem:[#allocation5 + $0x68] sm:$0xff]  }
  0x68   :  { %3013 = vmatpush3.bf16.msra.mxu0 %v3426_v46  ;;  %v3435_v55 = vld [vmem:[#allocation5 + $0xd8] sm:$0xff]   ;;  %v3439_v59 = vld [vmem:[#allocation5 + $0xe0] sm:$0xff]   ;;  %v3442_v62 = vld [vmem:[#allocation5 + $0x28] sm:$0xff]  }
  0x69   :  { %3014 = vmatprep.subr.bf16.mxu0 %v3429_v49  ;;  %v3436_v56 = vld [vmem:[#allocation5 + $0x98] sm:$0xff]   ;;  %v3440_v60 = vld [vmem:[#allocation5 + $0xa0] sm:$0xff]   ;;  %v3443_v63 = vld [vmem:[#allocation5 + $0xe8] sm:$0xff]  }
  0x6a   :  { %3035 = vmatpush3.bf16.msra.mxu1 %v3428_v48  ;;  %v3444_v0 = vld [vmem:[#allocation5 + $0xa8] sm:$0xff]   ;;  %v3445_v1 = vld [vmem:[#allocation5 + $0x70] sm:$0xff]   ;;  %v3449_v5 = vld [vmem:[#allocation5 + $0x78] sm:$0xff]  }
  0x6b   :  { %3036 = vmatprep.subr.bf16.mxu1 %v3431_v51  ;;  %v3446_v2 = vld [vmem:[#allocation5 + $0x30] sm:$0xff]   ;;  %v3450_v6 = vld [vmem:[#allocation5 + $0x38] sm:$0xff]   ;;  %v331_v8 = vld [vmem:[%s4368_s0] sm:$0xff] }
  0x6c   :  { %3015 = vmatpush3.bf16.msra.mxu0 %v3430_v50  ;;  %v3447_v3 = vld [vmem:[#allocation5 + $0xf0] sm:$0xff]   ;;  %v3451_v7 = vld [vmem:[#allocation5 + $0xf8] sm:$0xff]   ;;  %v334_v9 = vld [vmem:[%s4369_s1] sm:$0xff] }
  0x6d   :  { %3016 = vmatprep.subr.bf16.mxu0 %v3433_v53  ;;  %v3448_v4 = vld [vmem:[#allocation5 + $0xb0] sm:$0xff]   ;;  %v337_v10 = vmul.f32 %v334_v9, %v331_v8  ;;  %v3452_v11 = vld [vmem:[#allocation5 + $0xb8] sm:$0xff]   ;;  %v3453_v12 = vld [vmem:[#allocation5 + $0x140] sm:$0xff]  }
  0x6e   :  { %3037 = vmatpush3.bf16.msra.mxu1 %v3432_v52  ;;  %v332_v14 = vld [vmem:[%s4368_s0 + $0x8] sm:$0xff]  ;;  %v3454_v19 = vld [vmem:[#allocation5 + $0x100] sm:$0xff]   ;;  %v3457_v25 = vld [vmem:[#allocation5 + $0x150] sm:$0xff]  }
  0x6f   :  { %3038 = vmatprep.subr.bf16.mxu1 %v3435_v55  ;;  %v439_v13 = vcombine.high %v337_v10, %v337_v10  ;;  %v335_v15 = vld [vmem:[%s4369_s1 + $0x8] sm:$0xff]  ;;  %v445_v16 = vpack.c.bf16 %v337_v10, %v337_v10  ;;  %v3458_v26 = vld [vmem:[#allocation5 + $0x110] sm:$0xff]   ;;  %v3459_v27 = vld [vmem:[#allocation5 + $0x158] sm:$0xff]  }
  0x70   :  { %3017 = vmatpush3.bf16.msra.mxu0 %v3434_v54  ;;  %v338_v17 = vmul.f32 %v335_v15, %v332_v14  ;;  %v3455_v21 = vld [vmem:[#allocation5 + $0x148] sm:$0xff]   ;;  %v3460_v28 = vld [vmem:[#allocation5 + $0x118] sm:$0xff]   ;;  %v3461_v29 = vld [vmem:[#allocation5 + $0x160] sm:$0xff]  }
  0x71   :  { %3018 = vmatprep.subr.bf16.mxu0 %v3437_v57  ;;  %v446_v18 = vpack.c.bf16 %v439_v13, %v439_v13  ;;  %v3456_v24 = vld [vmem:[#allocation5 + $0x108] sm:$0xff]   ;;  %v333_v30 = vld [vmem:[%s4368_s0 + $0x10] sm:$0xff]  ;;  %v3462_v31 = vld [vmem:[#allocation5 + $0x120] sm:$0xff]  }
  0x72   :  { %3039 = vmatpush3.bf16.msra.mxu1 %v3436_v56  ;;  %v440_v20 = vcombine.high %v338_v17, %v338_v17  ;;  %v447_v22 = vpack.c.bf16 %v338_v17, %v338_v17  ;;  %v336_v32 = vld [vmem:[%s4369_s1 + $0x10] sm:$0xff]  ;;  %v3463_v33 = vld [vmem:[#allocation5 + $0x168] sm:$0xff]   ;;  %v3467_v40 = vld [vmem:[#allocation5 + $0x178] sm:$0xff]  }
  0x73   :  { %3040 = vmatprep.subr.bf16.mxu1 %v3439_v59  ;;  %778 = vmatprep.mubr.bf16.mxu0 %v446_v18  ;;  %v339_v34 = vmul.f32 %v336_v32, %v333_v30  ;;  %v3464_v36 = vld [vmem:[#allocation5 + $0x128] sm:$0xff]   ;;  %v3465_v37 = vld [vmem:[#allocation5 + $0x170] sm:$0xff]   ;;  %v3468_v41 = vld [vmem:[#allocation5 + $0x138] sm:$0xff]  }
  0x74   :  { %3019 = vmatpush3.bf16.msra.mxu0 %v3438_v58  ;;  %v448_v23 = vpack.c.bf16 %v440_v20, %v440_v20  ;;  %v3466_v39 = vld [vmem:[#allocation5 + $0x130] sm:$0xff]   ;;  %v3471_v43 = vld [vmem:[#allocation8 + $0x4] ss:$52 sps:$4 sm:$0xff]   ;;  %v3474_v44 = vld [vmem:[#allocation8 + $0xc] ss:$52 sps:$4 sm:$0xff]  }
  0x75   :  { %3020 = vmatprep.subr.bf16.mxu0 %v3441_v61  ;;  %v441_v35 = vcombine.high %v339_v34, %v339_v34  ;;  %v449_v42 = vpack.c.bf16 %v339_v34, %v339_v34  ;;  %v3469_v45 = vld [vmem:[#allocation8] ss:$52 sps:$4 sm:$0xff]   ;;  %v3472_v46 = vld [vmem:[#allocation8 + $0x8] ss:$52 sps:$4 sm:$0xff]   ;;  %v3478_v50 = vld [vmem:[#allocation8 + $0x70] ss:$52 sps:$4 sm:$0xff]  }
  0x76   :  { %3041 = vmatpush3.bf16.msra.mxu1 %v3440_v60  ;;  %818 = vmatprep.mubr.bf16.mxu1 %v448_v23  ;;  %v3477_v47 = vld [vmem:[#allocation8 + $0x6c] ss:$52 sps:$4 sm:$0xff]   ;;  %v3480_v48 = vld [vmem:[#allocation8 + $0x74] ss:$52 sps:$4 sm:$0xff]   ;;  %v3486_v52 = vld [vmem:[#allocation8 + $0xdc] ss:$52 sps:$4 sm:$0xff]  }
  0x77   :  { %3042 = vmatprep.subr.bf16.mxu1 %v3443_v63  ;;  %v450_v38 = vpack.c.bf16 %v441_v35, %v441_v35  ;;  %v3475_v49 = vld [vmem:[#allocation8 + $0x68] ss:$52 sps:$4 sm:$0xff]   ;;  %v3481_v53 = vld [vmem:[#allocation8 + $0xd0] ss:$52 sps:$4 sm:$0xff]   ;;  %v3484_v54 = vld [vmem:[#allocation8 + $0xd8] ss:$52 sps:$4 sm:$0xff]  }
  0x78   :  { %3021 = vmatpush3.bf16.msra.mxu0 %v3442_v62  ;;  %v3483_v51 = vld [vmem:[#allocation8 + $0xd4] ss:$52 sps:$4 sm:$0xff]   ;;  %v3489_v55 = vld [vmem:[#allocation8 + $0x13c] ss:$52 sps:$4 sm:$0xff]   ;;  %v3492_v56 = vld [vmem:[#allocation8 + $0x144] ss:$52 sps:$4 sm:$0xff]  }
  0x79   :  { %3022 = vmatprep.subr.bf16.mxu0 %v3445_v1  ;;  %v3487_v57 = vld [vmem:[#allocation8 + $0x138] ss:$52 sps:$4 sm:$0xff]   ;;  %v3490_v58 = vld [vmem:[#allocation8 + $0x140] ss:$52 sps:$4 sm:$0xff]   ;;  %v3496_v62 = vld [vmem:[#allocation8 + $0x1a8] ss:$52 sps:$4 sm:$0xff]  }
  0x7a   :  { %3043 = vmatpush3.bf16.msra.mxu1 %v3444_v0  ;;  %v3495_v59 = vld [vmem:[#allocation8 + $0x1a4] ss:$52 sps:$4 sm:$0xff]   ;;  %v3498_v60 = vld [vmem:[#allocation8 + $0x1ac] ss:$52 sps:$4 sm:$0xff]   ;;  %v3504_v0 = vld [vmem:[#allocation8 + $0x214] ss:$52 sps:$4 sm:$0xff]  }
  0x7b   :  { %3044 = vmatprep.subr.bf16.mxu1 %v3447_v3  ;;  %v3493_v61 = vld [vmem:[#allocation8 + $0x1a0] ss:$52 sps:$4 sm:$0xff]   ;;  %v3499_v1 = vld [vmem:[#allocation8 + $0x208] ss:$52 sps:$4 sm:$0xff]   ;;  %v3516_v8 = vld [vmem:[#allocation8 + $0x2e4] ss:$52 sps:$4 sm:$0xff]  }
  0x7c   :  { %3023 = vmatpush3.bf16.msra.mxu0 %v3446_v2  ;;  %v3501_v63 = vld [vmem:[#allocation8 + $0x20c] ss:$52 sps:$4 sm:$0xff]   ;;  %v3502_v2 = vld [vmem:[#allocation8 + $0x210] ss:$52 sps:$4 sm:$0xff]   ;;  %v3507_v3 = vld [vmem:[#allocation8 + $0x274] ss:$52 sps:$4 sm:$0xff]  }
  0x7d   :  { %3024 = vmatprep.subr.bf16.mxu0 %v3449_v5  ;;  %v3505_v5 = vld [vmem:[#allocation8 + $0x270] ss:$52 sps:$4 sm:$0xff]   ;;  %v3511_v9 = vld [vmem:[#allocation8 + $0x2d8] ss:$52 sps:$4 sm:$0xff]   ;;  %v3514_v10 = vld [vmem:[#allocation8 + $0x2e0] ss:$52 sps:$4 sm:$0xff]  }
  0x7e   :  { %3045 = vmatpush3.bf16.msra.mxu1 %v3448_v4  ;;  %v3510_v4 = vld [vmem:[#allocation8 + $0x27c] ss:$52 sps:$4 sm:$0xff]   ;;  %v2846_v15 = vld [vmem:[%s4372_s4] ss:$0 sm:$0xff]  ;;  %v3520_v34 = vld [vmem:[#allocation8 + $0x18] ss:$52 sps:$4 sm:$0xff]  }
  0x7f   :  { %3046 = vmatprep.subr.bf16.mxu1 %v3451_v7  ;;  %v3513_v7 = vld [vmem:[#allocation8 + $0x2dc] ss:$52 sps:$4 sm:$0xff]  }
  0x80   :  { %3025 = vmatpush3.bf16.msra.mxu0 %v3450_v6  ;;  %v3508_v6 = vld [vmem:[#allocation8 + $0x278] ss:$52 sps:$4 sm:$0xff]   ;;  %v3522_v13 = vld [vmem:[#allocation8 + $0x1c] ss:$52 sps:$4 sm:$0xff]  }
  0x81   :  { %3054 = vmatprep.subr.bf16.mxu0 %v3453_v12  ;;  %v3825_v12 = vmov 0  }
  0x82   :  { %3047 = vmatpush3.bf16.msra.mxu1 %v3452_v11  ;;  %v3519_v11 = vld [vmem:[#allocation8 + $0x14] ss:$52 sps:$4 sm:$0xff]  }
  0x83   :  { %779 = vmatmul.mubr.bf16.vlgmr.msra.gmra.mrb[0].mxu0 %v445_v16  ;;  %1576 = vmatprep.subr.bf16.mxu1 %v3471_v43  ;;  %v3532_v43 = vld [vmem:[#allocation8 + $0xe8] ss:$52 sps:$4 sm:$0xff]  }
  0x84   :  { %3055 = vmatpush3.bf16.msra.mxu0 %v3454_v19  ;;  %858 = vmatprep.mubr.bf16.mxu0 %v450_v38  ;;  %v3523_v38 = vld [vmem:[#allocation8 + $0x78] ss:$52 sps:$4 sm:$0xff]  }
  0x85   :  { %3056 = vmatprep.subr.bf16.mxu0 %v3455_v21  ;;  %819 = vmatmul.mubr.bf16.vlgmr.msra.gmra.mrb[0].mxu1 %v447_v22 }
  0x86   :  { %1577 = vmatpush1.bf16.msra.mxu1 %v3469_v45  ;;  %1608 = vmatprep.mubr.bf16.mxu1 %v3825_v12  ;;  %v3540_v45 = vld [vmem:[#allocation8 + $0x154] ss:$52 sps:$4 sm:$0xff]  }
  0x87   :  { %1578 = vmatprep.subr.bf16.mxu1 %v3477_v47  ;;  %v3538_v47 = vld [vmem:[#allocation8 + $0x150] ss:$52 sps:$4 sm:$0xff]  }
  0x88   :  { %3057 = vmatpush3.bf16.msra.mxu0 %v3456_v24 }
  0x89   :  { %3058 = vmatprep.subr.bf16.mxu0 %v3457_v25 }
  0x8a   :  { %1579 = vmatpush1.bf16.msra.mxu1 %v3475_v49  ;;  %v3546_v49 = vld [vmem:[#allocation8 + $0x1bc] ss:$52 sps:$4 sm:$0xff]  }
  0x8b   :  { %1580 = vmatprep.subr.bf16.mxu1 %v3483_v51  ;;  %v3544_v51 = vld [vmem:[#allocation8 + $0x1b8] ss:$52 sps:$4 sm:$0xff]  }
  0x8c   :  { %3059 = vmatpush3.bf16.msra.mxu0 %v3458_v26 }
  0x8d   :  { %3060 = vmatprep.subr.bf16.mxu0 %v3459_v27 }
  0x8e   :  { %1581 = vmatpush1.bf16.msra.mxu1 %v3481_v53  ;;  %v3552_v53 = vld [vmem:[#allocation8 + $0x224] ss:$52 sps:$4 sm:$0xff]  }
  0x8f   :  { %1582 = vmatprep.subr.bf16.mxu1 %v3489_v55  ;;  %v3550_v55 = vld [vmem:[#allocation8 + $0x220] ss:$52 sps:$4 sm:$0xff]  }
  0x90   :  { %3061 = vmatpush3.bf16.msra.mxu0 %v3460_v28 }
  0x91   :  { %3062 = vmatprep.subr.bf16.mxu0 %v3461_v29 }
  0x92   :  { %1583 = vmatpush1.bf16.msra.mxu1 %v3487_v57  ;;  %v3558_v57 = vld [vmem:[#allocation8 + $0x28c] ss:$52 sps:$4 sm:$0xff]  }
  0x93   :  { %1584 = vmatprep.subr.bf16.mxu1 %v3495_v59  ;;  %v3556_v59 = vld [vmem:[#allocation8 + $0x288] ss:$52 sps:$4 sm:$0xff]  }
  0x94   :  { %3063 = vmatpush3.bf16.msra.mxu0 %v3462_v31 }
  0x95   :  { %3064 = vmatprep.subr.bf16.mxu0 %v3463_v33  ;;  %v3517_v33 = vld [vmem:[#allocation8 + $0x10] ss:$52 sps:$4 sm:$0xff]  }
  0x96   :  { %1585 = vmatpush1.bf16.msra.mxu1 %v3493_v61  ;;  %v3564_v61 = vld [vmem:[#allocation8 + $0x2f4] ss:$52 sps:$4 sm:$0xff]  }
  0x97   :  { %1586 = vmatprep.subr.bf16.mxu1 %v3501_v63  ;;  %v3562_v63 = vld [vmem:[#allocation8 + $0x2f0] ss:$52 sps:$4 sm:$0xff]  }
  0x98   :  { %3065 = vmatpush3.bf16.msra.mxu0 %v3464_v36  ;;  %v3525_v36 = vld [vmem:[#allocation8 + $0x7c] ss:$52 sps:$4 sm:$0xff]  }
  0x99   :  { %3066 = vmatprep.subr.bf16.mxu0 %v3465_v37  ;;  %v3528_v37 = vld [vmem:[#allocation8 + $0x84] ss:$52 sps:$4 sm:$0xff]  }
  0x9a   :  { %1587 = vmatpush1.bf16.msra.mxu1 %v3499_v1  ;;  %v3570_v1 = vld [vmem:[#allocation8 + $0x2c] ss:$52 sps:$4 sm:$0xff]  }
  0x9b   :  { %1588 = vmatprep.subr.bf16.mxu1 %v3507_v3  ;;  %v3568_v3 = vld [vmem:[#allocation8 + $0x28] ss:$52 sps:$4 sm:$0xff]  }
  0x9c   :  { %3067 = vmatpush3.bf16.msra.mxu0 %v3466_v39  ;;  %v3526_v39 = vld [vmem:[#allocation8 + $0x80] ss:$52 sps:$4 sm:$0xff]  }
  0x9d   :  { %3068 = vmatprep.subr.bf16.mxu0 %v3467_v40  ;;  %v3531_v40 = vld [vmem:[#allocation8 + $0xe4] ss:$52 sps:$4 sm:$0xff]  }
  0x9e   :  { %1589 = vmatpush1.bf16.msra.mxu1 %v3505_v5  ;;  %v3576_v5 = vld [vmem:[#allocation8 + $0x94] ss:$52 sps:$4 sm:$0xff]  }
  0x9f   :  { %1590 = vmatprep.subr.bf16.mxu1 %v3513_v7  ;;  %v3574_v7 = vld [vmem:[#allocation8 + $0x90] ss:$52 sps:$4 sm:$0xff]  }
  0xa0   :  { %3069 = vmatpush3.bf16.msra.mxu0 %v3468_v41  ;;  %v3534_v41 = vld [vmem:[#allocation8 + $0xec] ss:$52 sps:$4 sm:$0xff]  }
  0xa1   :  { %1617 = vmatprep.subr.bf16.mxu0 %v3474_v44  ;;  %v3537_v44 = vld [vmem:[#allocation8 + $0x14c] ss:$52 sps:$4 sm:$0xff]  }
  0xa2   :  { %1591 = vmatpush1.bf16.msra.mxu1 %v3511_v9  ;;  %v3582_v9 = vld [vmem:[#allocation8 + $0xfc] ss:$52 sps:$4 sm:$0xff]  }
  0xa3   :  { %859 = vmatmul.mubr.bf16.vlgmr.msra.gmra.mrb[4].mxu0 %v449_v42  ;;  %1658 = vmatprep.subr.bf16.mxu1 %v3519_v11  ;;  %v3529_v42 = vld [vmem:[#allocation8 + $0xe0] ss:$52 sps:$4 sm:$0xff]   ;;  %v3580_v11 = vld [vmem:[#allocation8 + $0xf8] ss:$52 sps:$4 sm:$0xff]  }
  0xa4   :  { %1618 = vmatpush1.bf16.msra.mxu0 %v3472_v46  ;;  %1649 = vmatprep.mubr.bf16.mxu0 %v3825_v12  ;;  %v3535_v46 = vld [vmem:[#allocation8 + $0x148] ss:$52 sps:$4 sm:$0xff]  }
  0xa5   :  { %1619 = vmatprep.subr.bf16.mxu0 %v3480_v48  ;;  %v3543_v48 = vld [vmem:[#allocation8 + $0x1b4] ss:$52 sps:$4 sm:$0xff]  }
  0xa8   :  { %1620 = vmatpush1.bf16.msra.mxu0 %v3478_v50  ;;  %v3541_v50 = vld [vmem:[#allocation8 + $0x1b0] ss:$52 sps:$4 sm:$0xff]  }
  0xa9   :  { %1621 = vmatprep.subr.bf16.mxu0 %v3486_v52  ;;  %v3549_v52 = vld [vmem:[#allocation8 + $0x21c] ss:$52 sps:$4 sm:$0xff]  }
  0xac   :  { %1622 = vmatpush1.bf16.msra.mxu0 %v3484_v54  ;;  %v3547_v54 = vld [vmem:[#allocation8 + $0x218] ss:$52 sps:$4 sm:$0xff]  }
  0xad   :  { %1623 = vmatprep.subr.bf16.mxu0 %v3492_v56  ;;  %v3555_v56 = vld [vmem:[#allocation8 + $0x284] ss:$52 sps:$4 sm:$0xff]  }
  0xb0   :  { %1624 = vmatpush1.bf16.msra.mxu0 %v3490_v58  ;;  %v3553_v58 = vld [vmem:[#allocation8 + $0x280] ss:$52 sps:$4 sm:$0xff]  }
  0xb1   :  { %1625 = vmatprep.subr.bf16.mxu0 %v3498_v60  ;;  %v3561_v60 = vld [vmem:[#allocation8 + $0x2ec] ss:$52 sps:$4 sm:$0xff]  }
  0xb4   :  { %1626 = vmatpush1.bf16.msra.mxu0 %v3496_v62  ;;  %v3559_v62 = vld [vmem:[#allocation8 + $0x2e8] ss:$52 sps:$4 sm:$0xff]  }
  0xb5   :  { %1627 = vmatprep.subr.bf16.mxu0 %v3504_v0  ;;  %v3567_v0 = vld [vmem:[#allocation8 + $0x24] ss:$52 sps:$4 sm:$0xff]  }
  0xb8   :  { %1628 = vmatpush1.bf16.msra.mxu0 %v3502_v2  ;;  %v3565_v2 = vld [vmem:[#allocation8 + $0x20] ss:$52 sps:$4 sm:$0xff]  }
  0xb9   :  { %1629 = vmatprep.subr.bf16.mxu0 %v3510_v4  ;;  %v3573_v4 = vld [vmem:[#allocation8 + $0x8c] ss:$52 sps:$4 sm:$0xff]  }
  0xbc   :  { %1630 = vmatpush1.bf16.msra.mxu0 %v3508_v6  ;;  %v3571_v6 = vld [vmem:[#allocation8 + $0x88] ss:$52 sps:$4 sm:$0xff]  }
  0xbd   :  { %1631 = vmatprep.subr.bf16.mxu0 %v3516_v8  ;;  %v3579_v8 = vld [vmem:[#allocation8 + $0xf4] ss:$52 sps:$4 sm:$0xff]  }
  0xc0   :  { %1632 = vmatpush1.bf16.msra.mxu0 %v3514_v10  ;;  %v3577_v10 = vld [vmem:[#allocation8 + $0xf0] ss:$52 sps:$4 sm:$0xff]  }
  0xc1   :  { %1699 = vmatprep.subr.bf16.mxu0 %v3522_v13  ;;  %v3585_v13 = vld [vmem:[#allocation8 + $0x15c] ss:$52 sps:$4 sm:$0xff]  }
 0x156   :  { %v3026_v14 = vpop.f32.mrb[0].mxu0 }
 0x157   :  { %v3027_v16 = vpop.f32.mrb[1].mxu0 }
 0x158   :  { %v3028_v17 = vadd.f32 %v3027_v16, %v3026_v14  ;;  %v3029_v18 = vpop.f32.mrb[2].mxu0  ;;  %v3048_v19 = vpop.f32.mrb[0].mxu1  ;;  %v3588_v14 = vld [vmem:[#allocation8 + $0x164] ss:$52 sps:$4 sm:$0xff]   ;;  %v3586_v16 = vld [vmem:[#allocation8 + $0x160] ss:$52 sps:$4 sm:$0xff]  }
 0x159   :  { %v3030_v20 = vpop.f32.mrb[3].mxu0  ;;  %v3049_v22 = vpop.f32.mrb[1].mxu1  ;;  %v3594_v18 = vld [vmem:[#allocation8 + $0x1cc] ss:$52 sps:$4 sm:$0xff]  }
 0x15a   :  { %v781_v21 = vadd.f32 %v3028_v17, %v2846_v15  ;;  %v3050_v23 = vadd.f32 %v3049_v22, %v3048_v19  ;;  %v3051_v24 = vpop.f32.mrb[2].mxu1  ;;  %v3583_v15 = vld [vmem:[#allocation8 + $0x158] ss:$52 sps:$4 sm:$0xff]   ;;  %v3589_v19 = vld [vmem:[#allocation8 + $0x1c0] ss:$52 sps:$4 sm:$0xff]  }
 0x15b   :  { %v3052_v25 = vpop.f32.mrb[3].mxu1  ;;  %v3591_v17 = vld [vmem:[#allocation8 + $0x1c4] ss:$52 sps:$4 sm:$0xff]   ;;  %v3592_v20 = vld [vmem:[#allocation8 + $0x1c8] ss:$52 sps:$4 sm:$0xff]  }
 0x15c   :  { %v821_v26 = vadd.f32 %v3050_v23, %v781_v21  ;;  %v3597_v21 = vld [vmem:[#allocation8 + $0x22c] ss:$52 sps:$4 sm:$0xff]   ;;  %v3600_v22 = vld [vmem:[#allocation8 + $0x234] ss:$52 sps:$4 sm:$0xff]   ;;  %v3598_v24 = vld [vmem:[#allocation8 + $0x230] ss:$52 sps:$4 sm:$0xff]  }
 0x15d   :  { %v3595_v23 = vld [vmem:[#allocation8 + $0x228] ss:$52 sps:$4 sm:$0xff]  }
 0x15e   :  { %v3603_v25 = vld [vmem:[#allocation8 + $0x294] ss:$52 sps:$4 sm:$0xff]  }
 0x176   :  { %v3070_v27 = vpop.f32.mrb[4].mxu0 }
 0x177   :  { %v3071_v28 = vpop.f32.mrb[5].mxu0 }
 0x178   :  { %v3072_v29 = vadd.f32 %v3071_v28, %v3070_v27  ;;  %v3073_v30 = vpop.f32.mrb[6].mxu0  ;;  %v3601_v27 = vld [vmem:[#allocation8 + $0x290] ss:$52 sps:$4 sm:$0xff]   ;;  %v3604_v28 = vld [vmem:[#allocation8 + $0x298] ss:$52 sps:$4 sm:$0xff]  }
 0x179   :  { %v3074_v31 = vpop.f32.mrb[7].mxu0  ;;  %v3612_v30 = vld [vmem:[#allocation8 + $0x304] ss:$52 sps:$4 sm:$0xff]  }
 0x17a   :  { %v861_v32 = vadd.f32 %v3072_v29, %v821_v26  ;;  %v3606_v26 = vld [vmem:[#allocation8 + $0x29c] ss:$52 sps:$4 sm:$0xff]   ;;  %v3607_v31 = vld [vmem:[#allocation8 + $0x2f8] ss:$52 sps:$4 sm:$0xff]  }
 0x17b   :  { %v3609_v29 = vld [vmem:[#allocation8 + $0x2fc] ss:$52 sps:$4 sm:$0xff]  }
 0x17c   :  { %v4096_v35 = vpack.c.bf16 %v861_v32, %v861_v32  ;;  %v3610_v32 = vld [vmem:[#allocation8 + $0x300] ss:$52 sps:$4 sm:$0xff]  }
 0x17e   :  { %1609 = vmatmul.mubr.bf16.vlgmr.msra.gmra.mrb[4].mxu1 %v4096_v35  ;;  %1650 = vmatmul.mubr.bf16.vlgmr.msra.gmra.mrb[8].mxu0 %v4096_v35 }
 0x17f   :  { %1659 = vmatpush1.bf16.msra.mxu1 %v3517_v33  ;;  %1700 = vmatpush1.bf16.msra.mxu0 %v3520_v34  ;;  %v3613_v33 = vld [vmem:[#allocation8 + $0x30] ss:$52 sps:$4 sm:$0xff]   ;;  %v3826_v34 = vmov 0.0  }
 0x180   :  { %1660 = vmatprep.subr.bf16.mxu1 %v3525_v36  ;;  %1701 = vmatprep.subr.bf16.mxu0 %v3528_v37  ;;  %v3614_v36 = vld [vmem:[#allocation8 + $0x98] ss:$52 sps:$4 sm:$0xff]   ;;  %v3615_v37 = vld [vmem:[#allocation8 + $0x100] ss:$52 sps:$4 sm:$0xff]  }
 0x181   :  { %1690 = vmatprep.mubr.bf16.mxu1 %v3825_v12  ;;  %1731 = vmatprep.mubr.bf16.mxu0 %v3825_v12 }
 0x183   :  { %1661 = vmatpush1.bf16.msra.mxu1 %v3523_v38  ;;  %1702 = vmatpush1.bf16.msra.mxu0 %v3526_v39  ;;  %v3616_v38 = vld [vmem:[#allocation8 + $0x168] ss:$52 sps:$4 sm:$0xff]   ;;  %v3617_v39 = vld [vmem:[#allocation8 + $0x1d0] ss:$52 sps:$4 sm:$0xff]  }
 0x184   :  { %1662 = vmatprep.subr.bf16.mxu1 %v3531_v40  ;;  %1703 = vmatprep.subr.bf16.mxu0 %v3534_v41  ;;  %v983_v40 = vlaneseq  ;;  %v3618_v41 = vld [vmem:[#allocation8 + $0x238] ss:$52 sps:$4 sm:$0xff]  }
 0x187   :  { %1663 = vmatpush1.bf16.msra.mxu1 %v3529_v42  ;;  %1704 = vmatpush1.bf16.msra.mxu0 %v3532_v43  ;;  %v4118_v42 = vshrl.u32 %v983_v40, 7  ;;  %v3619_v43 = vld [vmem:[#allocation8 + $0x2a0] ss:$52 sps:$4 sm:$0xff]  }
 0x188   :  { %1664 = vmatprep.subr.bf16.mxu1 %v3537_v44  ;;  %1705 = vmatprep.subr.bf16.mxu0 %v3540_v45  ;;  %v4123_v45 = vld [vmem:[#allocation10 + $0x8] sm:$0x1f] }
 0x189   :  { %v993_v44 = vsub.s32 2, %v4118_v42 }
 0x18b   :  { %1665 = vmatpush1.bf16.msra.mxu1 %v3535_v46  ;;  %1706 = vmatpush1.bf16.msra.mxu0 %v3538_v47  ;;  %v4126_v46 = vrot.slane %v4123_v45, %v993_v44  ;;  %v3620_v47 = vld [vmem:[#allocation8 + $0x308] ss:$52 sps:$4 sm:$0xff]  }
 0x18c   :  { %1666 = vmatprep.subr.bf16.mxu1 %v3543_v48  ;;  %1707 = vmatprep.subr.bf16.mxu0 %v3546_v49  ;;  %v997_v48 = vsub.s32 3, %v4118_v42 }
 0x18e   :  { %v4132_v49 = vrot.slane %v4123_v45, %v997_v48 }
 0x18f   :  { %1667 = vmatpush1.bf16.msra.mxu1 %v3541_v50  ;;  %1708 = vmatpush1.bf16.msra.mxu0 %v3544_v51  ;;  %v1001_v50 = vsub.s32 4, %v4118_v42 }
 0x190   :  { %1668 = vmatprep.subr.bf16.mxu1 %v3549_v52  ;;  %1709 = vmatprep.subr.bf16.mxu0 %v3552_v53  ;;  %v3621_v52 = vld [vmem:[%s4375_s7] sm:$0xff]   ;;  %v3622_v53 = vld [vmem:[%s4375_s7 + $0x8] sm:$0xff]  }
 0x191   :  { %v4136_v51 = vrot.slane %v4123_v45, %v1001_v50 }
 0x193   :  { %1669 = vmatpush1.bf16.msra.mxu1 %v3547_v54  ;;  %1710 = vmatpush1.bf16.msra.mxu0 %v3550_v55  ;;  %v979_v54 = vld [vmem:[#allocation10] sm:$0xff]  ;;  %v989_v55 = vsub.s32 1, %v4118_v42 }
 0x194   :  { %1670 = vmatprep.subr.bf16.mxu1 %v3555_v56  ;;  %1711 = vmatprep.subr.bf16.mxu0 %v3558_v57  ;;  %v994_v56 = vrot.slane %v979_v54, %v993_v44  ;;  %v3626_v44 = vld [vmem:[%s4375_s7 + $0x28] sm:$0xff]  }
 0x195   :  { %v990_v57 = vrot.slane %v979_v54, %v989_v55 }
 0x197   :  { %1671 = vmatpush1.bf16.msra.mxu1 %v3553_v58  ;;  %1712 = vmatpush1.bf16.msra.mxu0 %v3556_v59  ;;  %v998_v58 = vrot.slane %v979_v54, %v997_v48  ;;  %v3628_v48 = vld [vmem:[%s4375_s7 + $0x38] sm:$0xff]  }
 0x198   :  { %1672 = vmatprep.subr.bf16.mxu1 %v3561_v60  ;;  %1713 = vmatprep.subr.bf16.mxu0 %v3564_v61 }
 0x19b   :  { %1673 = vmatpush1.bf16.msra.mxu1 %v3559_v62  ;;  %1714 = vmatpush1.bf16.msra.mxu0 %v3562_v63 }
 0x19c   :  { %1740 = vmatprep.subr.bf16.mxu1 %v3567_v0  ;;  %1781 = vmatprep.subr.bf16.mxu0 %v3570_v1 }
 0x19e   :  { %1691 = vmatmul.mubr.bf16.vlgmr.msra.gmra.mrb[8].mxu1 %v4096_v35  ;;  %1732 = vmatmul.mubr.bf16.vlgmr.msra.gmra.mrb[12].mxu0 %v4096_v35 }
 0x19f   :  { %1741 = vmatpush1.bf16.msra.mxu1 %v3565_v2  ;;  %1782 = vmatpush1.bf16.msra.mxu0 %v3568_v3 }
 0x1a0   :  { %1742 = vmatprep.subr.bf16.mxu1 %v3573_v4  ;;  %1783 = vmatprep.subr.bf16.mxu0 %v3576_v5 }
 0x1a1   :  { %1772 = vmatprep.mubr.bf16.mxu1 %v3825_v12  ;;  %1813 = vmatprep.mubr.bf16.mxu0 %v3825_v12 }
 0x1a3   :  { %1743 = vmatpush1.bf16.msra.mxu1 %v3571_v6  ;;  %1784 = vmatpush1.bf16.msra.mxu0 %v3574_v7 }
 0x1a4   :  { %1744 = vmatprep.subr.bf16.mxu1 %v3579_v8  ;;  %1785 = vmatprep.subr.bf16.mxu0 %v3582_v9  ;;  %v985_v8 = vsub.s32 0, %v4118_v42 }
 0x1a6   :  { %v986_v9 = vrot.slane %v979_v54, %v985_v8 }
 0x1a7   :  { %1745 = vmatpush1.bf16.msra.mxu1 %v3577_v10  ;;  %1786 = vmatpush1.bf16.msra.mxu0 %v3580_v11 }
 0x1a8   :  { %1746 = vmatprep.subr.bf16.mxu1 %v3585_v13  ;;  %1787 = vmatprep.subr.bf16.mxu0 %v3588_v14  ;;  %v1865_v13 = vld [vmem:[%s4370_s2] sm:$0x3] }
 0x1ab   :  { %1747 = vmatpush1.bf16.msra.mxu1 %v3583_v15  ;;  %1788 = vmatpush1.bf16.msra.mxu0 %v3586_v16 }
 0x1ac   :  { %1748 = vmatprep.subr.bf16.mxu1 %v3591_v17  ;;  %1789 = vmatprep.subr.bf16.mxu0 %v3594_v18 }
 0x1af   :  { %1749 = vmatpush1.bf16.msra.mxu1 %v3589_v19  ;;  %1790 = vmatpush1.bf16.msra.mxu0 %v3592_v20  ;;  %v1009_v19 = vsub.s32 6, %v4118_v42  ;;  %v1005_v20 = vsub.s32 5, %v4118_v42 }
 0x1b0   :  { %1750 = vmatprep.subr.bf16.mxu1 %v3597_v21  ;;  %1791 = vmatprep.subr.bf16.mxu0 %v3600_v22  ;;  %v1013_v21 = vsub.s32 7, %v4118_v42 }
 0x1b3   :  { %1751 = vmatpush1.bf16.msra.mxu1 %v3595_v23  ;;  %1792 = vmatpush1.bf16.msra.mxu0 %v3598_v24  ;;  %v1002_v23 = vrot.slane %v979_v54, %v1001_v50  ;;  %v1010_v24 = vrot.slane %v979_v54, %v1009_v19  ;;  %v1018_v50 = vrot.slane %v4123_v45, %v985_v8 }
 0x1b4   :  { %1752 = vmatprep.subr.bf16.mxu1 %v3603_v25  ;;  %1793 = vmatprep.subr.bf16.mxu0 %v3606_v26  ;;  %v1006_v25 = vrot.slane %v979_v54, %v1005_v20  ;;  %v1014_v26 = vrot.slane %v979_v54, %v1013_v21 }
 0x1b7   :  { %1753 = vmatpush1.bf16.msra.mxu1 %v3601_v27  ;;  %1794 = vmatpush1.bf16.msra.mxu0 %v3604_v28 }
 0x1b8   :  { %1754 = vmatprep.subr.bf16.mxu1 %v3609_v29  ;;  %1795 = vmatprep.subr.bf16.mxu0 %v3612_v30 }
 0x1bb   :  { %1755 = vmatpush1.bf16.msra.mxu1 %v3607_v31  ;;  %1796 = vmatpush1.bf16.msra.mxu0 %v3610_v32 }
 0x1bc   :  { %3175 = vmatprep.subr.bf16.mxu1 %v3826_v34  ;;  %3195 = vmatprep.subr.bf16.mxu0 %v3826_v34 }
 0x1be   :  { %1773 = vmatmul.mubr.bf16.vlgmr.msra.gmra.mrb[12].mxu1 %v4096_v35  ;;  %1814 = vmatmul.mubr.bf16.vlgmr.msra.gmra.mrb[16].mxu0 %v4096_v35 }
 0x1bf   :  { %3176 = vmatpush3.bf16.msra.mxu1 %v3613_v33  ;;  %3191 = vmatprep.mubr.msk.bf16.mxu1 %vm3827_vm0, %v3826_v34 }
 0x1c0   :  { %3177 = vmatprep.subr.bf16.mxu1 %v3826_v34  ;;  %3211 = vmatprep.mubr.msk.bf16.mxu0 %vm3827_vm0, %v3826_v34 }
 0x1c1   :  { %3196 = vmatpush3.bf16.msra.mxu0 %v3621_v52  ;;  %v1022_v52 = vrot.slane %v4123_v45, %v989_v55  ;;  %v2999_v45 = vld [vmem:[%s4376_s8] ss:$0 sm:$0xff] }
 0x1c2   :  { %3197 = vmatprep.subr.bf16.mxu0 %v3826_v34 }
 0x1c3   :  { %3178 = vmatpush3.bf16.msra.mxu1 %v3614_v36 }
 0x1c4   :  { %3179 = vmatprep.subr.bf16.mxu1 %v3826_v34 }
 0x1c5   :  { %3198 = vmatpush3.bf16.msra.mxu0 %v3622_v53 }
 0x1c6   :  { %3199 = vmatprep.subr.bf16.mxu0 %v3826_v34 }
 0x1c7   :  { %3180 = vmatpush3.bf16.msra.mxu1 %v3615_v37 }
 0x1c8   :  { %3181 = vmatprep.subr.bf16.mxu1 %v3826_v34 }
 0x1cb   :  { %3182 = vmatpush3.bf16.msra.mxu1 %v3616_v38 }
 0x1cc   :  { %3183 = vmatprep.subr.bf16.mxu1 %v3826_v34 }
 0x1cf   :  { %3184 = vmatpush3.bf16.msra.mxu1 %v3617_v39 }
 0x1d0   :  { %3185 = vmatprep.subr.bf16.mxu1 %v3826_v34 }
 0x1d3   :  { %3186 = vmatpush3.bf16.msra.mxu1 %v3618_v41  ;;  %v3624_v41 = vld [vmem:[%s4375_s7 + $0x18] sm:$0xff]  }
 0x1d4   :  { %3187 = vmatprep.subr.bf16.mxu1 %v3826_v34 }
 0x1d7   :  { %3188 = vmatpush3.bf16.msra.mxu1 %v3619_v43  ;;  %v3625_v43 = vld [vmem:[%s4375_s7 + $0x20] sm:$0xff]  }
 0x1d8   :  { %3189 = vmatprep.subr.bf16.mxu1 %v3826_v34 }
 0x1db   :  { %3190 = vmatpush3.bf16.msra.mxu1 %v3620_v47  ;;  %v3627_v47 = vld [vmem:[%s4375_s7 + $0x30] sm:$0xff]  }
 0x1de   :  { %3192 = vmatmul.mubr.bf16.vlgmr.msra.gmra.mrb[16].mxu1 %v4096_v35  ;;  %v3623_v35 = vld [vmem:[%s4375_s7 + $0x10] sm:$0xff]  }
 0x1df   :  { %3200 = vmatpush3.bf16.msra.mxu0 %v3623_v35 }
 0x1e0   :  { %3201 = vmatprep.subr.bf16.mxu0 %v3826_v34 }
 0x1e3   :  { %3202 = vmatpush3.bf16.msra.mxu0 %v3624_v41 }
 0x1e4   :  { %3203 = vmatprep.subr.bf16.mxu0 %v3826_v34 }
 0x1e7   :  { %3204 = vmatpush3.bf16.msra.mxu0 %v3625_v43 }
 0x1e8   :  { %3205 = vmatprep.subr.bf16.mxu0 %v3826_v34 }
 0x1eb   :  { %3206 = vmatpush3.bf16.msra.mxu0 %v3626_v44 }
 0x1ec   :  { %3207 = vmatprep.subr.bf16.mxu0 %v3826_v34 }
 0x1ef   :  { %3208 = vmatpush3.bf16.msra.mxu0 %v3627_v47 }
 0x1f0   :  { %3209 = vmatprep.subr.bf16.mxu0 %v3826_v34 }
 0x1f3   :  { %3210 = vmatpush3.bf16.msra.mxu0 %v3628_v48 }
 0x251   :  { %v1610_v59 = vpop.f32.mrb[4].mxu1  ;;  %v1651_v60 = vpop.f32.mrb[8].mxu0 }
 0x252   :  { %v4153_v61 = vadd.f32 %v1651_v60, %v994_v56  ;;  %v1612_v62 = vpop.f32.mrb[5].mxu1  ;;  %v1653_v63 = vpop.f32.mrb[9].mxu0  ;;  %v4161_v10 = vadd.f32 %v1610_v59, %v986_v9 }
 0x253   :  { %v4155_v0 = vadd.f32 %v1612_v62, %v990_v57  ;;  %v4157_v1 = vadd.f32 %v1653_v63, %v998_v58  ;;  %v1614_v2 = vpop.f32.mrb[6].mxu1  ;;  %v1655_v3 = vpop.f32.mrb[10].mxu0 }
 0x254   :  { %v1615_v4 = vpop.f32.mrb[7].mxu1  ;;  %v1656_v5 = vpop.f32.mrb[11].mxu0  ;;  %v1871_v15 = vrot.slane %v4161_v10, 2 }
 0x255   :  { %v1862_v6 = vmul.f32 0.5, %v4155_v0 }
 0x257   :  { %v1863_v7 = vmul.f32 1.442695, %v1862_v6 }
 0x259   :  { %3629 = vpow2.f32 %v1863_v7 }
 0x263   :  { %v3630_v11 = vpop.eup %3629 }
 0x264   :  { %v1867_v14 = vrot.slane %v3630_v11, 2 }
 0x266   :  { %v1869_v16 = vmul.f32 %v1867_v14, %v1865_v13 }
 0x268   :  { %v1873_v17 = vadd.f32 %v1871_v15, %v1869_v16 }
 0x26a   :  { %v1874_v18 = vmul.f32 %v1873_v17, %v1873_v17 }
 0x26c   :  { %v1876_v22 = vsel %vm1875_vm1, %v1874_v18, 0.0 }
 0x26d   :  { %1877 = vadd.xlane.f32.xlu0 %v1876_v22 }
 0x271   :  { %v1692_v27 = vpop.f32.mrb[8].mxu1  ;;  %v1733_v28 = vpop.f32.mrb[12].mxu0 }
 0x272   :  { %v4171_v29 = vadd.f32 %v1692_v27, %v1002_v23  ;;  %v4173_v30 = vadd.f32 %v1733_v28, %v1010_v24  ;;  %v1694_v31 = vpop.f32.mrb[9].mxu1  ;;  %v1735_v32 = vpop.f32.mrb[13].mxu0 }
 0x273   :  { %v4175_v33 = vadd.f32 %v1694_v31, %v1006_v25  ;;  %v4177_v36 = vadd.f32 %v1735_v32, %v1014_v26  ;;  %v1696_v37 = vpop.f32.mrb[10].mxu1  ;;  %v1737_v38 = vpop.f32.mrb[14].mxu0 }
 0x274   :  { %v1697_v39 = vpop.f32.mrb[11].mxu1  ;;  %v1738_v40 = vpop.f32.mrb[15].mxu0 }
 0x291   :  { %v1774_v53 = vpop.f32.mrb[12].mxu1 }
 0x292   :  { %v4202_v35 = vadd.f32 %v1774_v53, %v1018_v50  ;;  %v1776_v54 = vpop.f32.mrb[13].mxu1 }
 0x293   :  { %v4204_v56 = vadd.f32 %v1776_v54, %v1022_v52  ;;  %v1778_v57 = vpop.f32.mrb[14].mxu1 }
 0x294   :  { %v1779_v58 = vpop.f32.mrb[15].mxu1 }
 0x2fa   :  { %v1878_v59 = vpop.xlane.xlu0 %1877 }
 0x2fb   :  { %v1880_v60 = vmul.f32 0.0078125, %v1878_v59 }
 0x2fd   :  { %v1881_v62 = vadd.f32 1e-08, %v1880_v60 }
 0x2ff   :  { %3631 = vrsqrt.f32 %v1881_v62 }
 0x309   :  { %v3632_v63 = vpop.eup %3631 }
 0x30a   :  { %v1883_v2 = vmul.f32 %v3632_v63, %v1873_v17 }
 0x30c   :  { %v1900_v3 = vpack.c.bf16 %v1883_v2, %v1883_v2 }
 0x30e   :  { %3212 = vmatmul.mubr.bf16.vlgmr.msra.gmra.mrb[20].mxu0 %v1900_v3 }
 0x3e1   :  { %v1990_v55 = vpop.f32.mrb[20].mxu0 }
 0x3e2   :  { %v1991_v4 = vadd.f32 %v2999_v45, %v1990_v55  ;;  %v3213_v5 = vpop.f32.mrb[21].mxu0 }
 0x3e3   :  { %v1993_v6 = vpop.f32.mrb[22].mxu0 }
 0x3e4   :  { %vm1996_vm2 = vcmp.gt.f32.partialorder %v1991_v4, 0.0  ;;  %v1997_v7 = vmul.f32 0.2, %v1991_v4  ;;  %v3214_v8 = vpop.f32.mrb[23].mxu0 }
 0x3e6   :  { %v1998_v9 = vsel %vm1996_vm2, %v1991_v4, %v1997_v7 }
 0x3e7   :  { %v1999_v11 = vmul.f32 %v1998_v9, %v1998_v9  ;;  %v2000_v13 = vsel %vm1875_vm1, %v1998_v9, 0.0 }
 0x3e8   :  { %v2001_v14 = vrot.slane %v2000_v13, 4 }
 0x3e9   :  { %v2007_v15 = vsel %vm1875_vm1, %v1999_v11, 0.0 }
 0x3ea   :  { %v2002_v16 = vadd.f32 %v2001_v14, %v2000_v13  ;;  %v2008_v17 = vrot.slane %v2007_v15, 4 }
 0x3ec   :  { %v2003_v18 = vrot.slane %v2002_v16, 2  ;;  %v2009_v19 = vadd.f32 %v2008_v17, %v2007_v15 }
 0x3ee   :  { %v2004_v20 = vadd.f32 %v2003_v18, %v2002_v16  ;;  %v2010_v21 = vrot.slane %v2009_v19, 2 }
 0x3f0   :  { %v2005_v22 = vrot.slane %v2004_v20, 1  ;;  %v2011_v23 = vadd.f32 %v2010_v21, %v2009_v19 }
 0x3f2   :  { %v2006_v24 = vadd.f32 %v2005_v22, %v2004_v20  ;;  %v2012_v25 = vrot.slane %v2011_v23, 1 }
 0x3f4   :  { %v2013_v26 = vadd.f32 %v2012_v25, %v2011_v23  ;;  %v2014_v27 = vmul.f32 0.5, %v2006_v24 }
 0x3f6   :  { %v2015_v28 = vmul.f32 0.5, %v2013_v26  ;;  %v2016_v31 = vmul.f32 %v2014_v27, %v2014_v27  ;;  %v2019_v39 = vsub.f32 %v1998_v9, %v2014_v27 }
 0x3f8   :  { %v2017_v32 = vsub.f32 %v2015_v28, %v2016_v31 }
 0x3fa   :  { %v2018_v37 = vmax.f32 %v2017_v32, 0.0 }
 0x3fc   :  { %v2020_v38 = vadd.f32 1e-05, %v2018_v37 }
 0x3fe   :  { %3633 = vrsqrt.f32 %v2020_v38 }
 0x408   :  { %v3634_v40 = vpop.eup %3633 }
 0x409   :  { %v2022_v41 = vmul.f32 %v3634_v40, %v2019_v39 }
 0x40a   :  { %3809 = dma.done.wait [#allocation4], 8192 }
 0x40b   :  { %3810 = vsyncadd [#allocation4], 4294959104  ;;  %3215 = vmatprep.subr.bf16.mxu1 %v3826_v34  ;;  %3231 = vmatprep.mubr.msk.bf16.mxu1 %vm3827_vm0, %v3826_v34  ;;  %v2028_v43 = vld [vmem:[#allocation2] sm:$0xff]  ;;  %v2029_v44 = vld [vmem:[#allocation2 + $0x8] sm:$0xff]  ;;  %v2036_v57 = vpack.c.bf16 %v2022_v41, %v2022_v41 }
 0x40c   :  { %3235 = vmatprep.subr.bf16.mxu0 %v3826_v34  ;;  %3251 = vmatprep.mubr.msk.bf16.mxu0 %vm3827_vm0, %v3826_v34  ;;  %v2030_v47 = vld [vmem:[#allocation2 + $0x10] sm:$0xff]  ;;  %v2031_v48 = vld [vmem:[#allocation2 + $0x18] sm:$0xff]  ;;  %v2032_v50 = vld [vmem:[#allocation2 + $0x20] sm:$0xff] }
 0x40d   :  { %3216 = vmatpush3.bf16.msra.mxu1 %v2028_v43  ;;  %v2033_v52 = vld [vmem:[#allocation2 + $0x28] sm:$0xff]  ;;  %v2034_v53 = vld [vmem:[#allocation2 + $0x30] sm:$0xff]  ;;  %v2035_v54 = vld [vmem:[#allocation2 + $0x38] sm:$0xff] }
 0x40e   :  { %3217 = vmatprep.subr.bf16.mxu1 %v3826_v34  ;;  %v2105_v58 = vld [vmem:[#allocation2 + $0x40] sm:$0xff]  ;;  %v2106_v59 = vld [vmem:[#allocation2 + $0x48] sm:$0xff]  ;;  %v2107_v60 = vld [vmem:[#allocation2 + $0x50] sm:$0xff] }
 0x40f   :  { %3236 = vmatpush3.bf16.msra.mxu0 %v2105_v58  ;;  %v2108_v62 = vld [vmem:[#allocation2 + $0x58] sm:$0xff]  ;;  %v2109_v63 = vld [vmem:[#allocation2 + $0x60] sm:$0xff]  ;;  %v2110_v2 = vld [vmem:[#allocation2 + $0x68] sm:$0xff] }
 0x410   :  { %3237 = vmatprep.subr.bf16.mxu0 %v3826_v34  ;;  %v2111_v3 = vld [vmem:[#allocation2 + $0x70] sm:$0xff]  ;;  %v2112_v45 = vld [vmem:[#allocation2 + $0x78] sm:$0xff]  ;;  %v2182_v43 = vld [vmem:[#allocation2 + $0x80] sm:$0xff] }
 0x411   :  { %3218 = vmatpush3.bf16.msra.mxu1 %v2029_v44  ;;  %v2183_v44 = vld [vmem:[#allocation2 + $0x88] sm:$0xff] }
 0x412   :  { %3219 = vmatprep.subr.bf16.mxu1 %v3826_v34 }
 0x413   :  { %3238 = vmatpush3.bf16.msra.mxu0 %v2106_v59 }
 0x414   :  { %3239 = vmatprep.subr.bf16.mxu0 %v3826_v34 }
 0x415   :  { %3220 = vmatpush3.bf16.msra.mxu1 %v2030_v47  ;;  %v2184_v47 = vld [vmem:[#allocation2 + $0x90] sm:$0xff] }
 0x416   :  { %3221 = vmatprep.subr.bf16.mxu1 %v3826_v34 }
 0x417   :  { %3240 = vmatpush3.bf16.msra.mxu0 %v2107_v60 }
 0x418   :  { %3241 = vmatprep.subr.bf16.mxu0 %v3826_v34 }
 0x419   :  { %3222 = vmatpush3.bf16.msra.mxu1 %v2031_v48  ;;  %v2185_v48 = vld [vmem:[#allocation2 + $0x98] sm:$0xff] }
 0x41a   :  { %3223 = vmatprep.subr.bf16.mxu1 %v3826_v34 }
 0x41b   :  { %3242 = vmatpush3.bf16.msra.mxu0 %v2108_v62 }
 0x41c   :  { %3243 = vmatprep.subr.bf16.mxu0 %v3826_v34 }
 0x41d   :  { %3224 = vmatpush3.bf16.msra.mxu1 %v2032_v50  ;;  %v2186_v50 = vld [vmem:[#allocation2 + $0xa0] sm:$0xff] }
 0x41e   :  { %3225 = vmatprep.subr.bf16.mxu1 %v3826_v34 }
 0x41f   :  { %3244 = vmatpush3.bf16.msra.mxu0 %v2109_v63 }
 0x420   :  { %3245 = vmatprep.subr.bf16.mxu0 %v3826_v34 }
 0x421   :  { %3226 = vmatpush3.bf16.msra.mxu1 %v2033_v52  ;;  %v2187_v52 = vld [vmem:[#allocation2 + $0xa8] sm:$0xff] }
 0x422   :  { %3227 = vmatprep.subr.bf16.mxu1 %v3826_v34 }
 0x423   :  { %3246 = vmatpush3.bf16.msra.mxu0 %v2110_v2 }
 0x424   :  { %3247 = vmatprep.subr.bf16.mxu0 %v3826_v34 }
 0x425   :  { %3228 = vmatpush3.bf16.msra.mxu1 %v2034_v53  ;;  %v2188_v53 = vld [vmem:[#allocation2 + $0xb0] sm:$0xff] }
 0x426   :  { %3229 = vmatprep.subr.bf16.mxu1 %v3826_v34 }
 0x427   :  { %3248 = vmatpush3.bf16.msra.mxu0 %v2111_v3 }
 0x428   :  { %3249 = vmatprep.subr.bf16.mxu0 %v3826_v34 }
 0x429   :  { %3230 = vmatpush3.bf16.msra.mxu1 %v2035_v54  ;;  %v2189_v54 = vld [vmem:[#allocation2 + $0xb8] sm:$0xff] }
 0x42a   :  { %3255 = vmatprep.subr.bf16.mxu1 %v3826_v34 }
 0x42b   :  { %3250 = vmatpush3.bf16.msra.mxu0 %v2112_v45 }
 0x42c   :  { %3232 = vmatmul.mubr.bf16.vlgmr.msra.gmra.mrb[20].mxu1 %v2036_v57  ;;  %3275 = vmatprep.subr.bf16.mxu0 %v3826_v34 }
 0x42d   :  { %3271 = vmatprep.mubr.msk.bf16.mxu1 %vm3827_vm0, %v3826_v34  ;;  %3256 = vmatpush3.bf16.msra.mxu1 %v2182_v43 }
 0x42e   :  { %3257 = vmatprep.subr.bf16.mxu1 %v3826_v34 }
 0x431   :  { %3258 = vmatpush3.bf16.msra.mxu1 %v2183_v44 }
 0x432   :  { %3259 = vmatprep.subr.bf16.mxu1 %v3826_v34 }
 0x435   :  { %3260 = vmatpush3.bf16.msra.mxu1 %v2184_v47 }
 0x436   :  { %3261 = vmatprep.subr.bf16.mxu1 %v3826_v34 }
 0x439   :  { %3262 = vmatpush3.bf16.msra.mxu1 %v2185_v48 }
 0x43a   :  { %3263 = vmatprep.subr.bf16.mxu1 %v3826_v34 }
 0x43d   :  { %3264 = vmatpush3.bf16.msra.mxu1 %v2186_v50 }
 0x43e   :  { %3265 = vmatprep.subr.bf16.mxu1 %v3826_v34 }
 0x441   :  { %3266 = vmatpush3.bf16.msra.mxu1 %v2187_v52 }
 0x442   :  { %3267 = vmatprep.subr.bf16.mxu1 %v3826_v34 }
 0x445   :  { %3268 = vmatpush3.bf16.msra.mxu1 %v2188_v53 }
 0x446   :  { %3269 = vmatprep.subr.bf16.mxu1 %v3826_v34 }
 0x449   :  { %3270 = vmatpush3.bf16.msra.mxu1 %v2189_v54 }
 0x44a   :  { %3295 = vmatprep.subr.bf16.mxu1 %v3826_v34 }
 0x4ff   :  { %v2071_v55 = vpop.f32.mrb[20].mxu1 }
 0x500   :  { %v2072_v4 = vadd.f32 %v2071_v55, %v4153_v61  ;;  %v3233_v5 = vpop.f32.mrb[21].mxu1 }
 0x501   :  { %v2074_v6 = vpop.f32.mrb[22].mxu1 }
 0x502   :  { %vm2077_vm3 = vcmp.gt.f32.partialorder %v2072_v4, 0.0  ;;  %v2078_v7 = vmul.f32 0.2, %v2072_v4  ;;  %v3234_v8 = vpop.f32.mrb[23].mxu1 }
 0x504   :  { %v2079_v9 = vsel %vm2077_vm3, %v2072_v4, %v2078_v7 }
 0x505   :  { %v2080_v11 = vmul.f32 %v2079_v9, %v2079_v9  ;;  %v2081_v13 = vsel %vm1875_vm1, %v2079_v9, 0.0 }
 0x506   :  { %v2082_v14 = vrot.slane %v2081_v13, 4 }
 0x507   :  { %v2088_v15 = vsel %vm1875_vm1, %v2080_v11, 0.0 }
 0x508   :  { %v2083_v16 = vadd.f32 %v2082_v14, %v2081_v13  ;;  %v2089_v17 = vrot.slane %v2088_v15, 4 }
 0x50a   :  { %v2084_v18 = vrot.slane %v2083_v16, 2  ;;  %v2090_v19 = vadd.f32 %v2089_v17, %v2088_v15 }
 0x50c   :  { %v2085_v20 = vadd.f32 %v2084_v18, %v2083_v16  ;;  %v2091_v21 = vrot.slane %v2090_v19, 2 }
 0x50e   :  { %v2092_v22 = vadd.f32 %v2091_v21, %v2090_v19  ;;  %v2086_v61 = vrot.slane %v2085_v20, 1 }
 0x510   :  { %v2093_v23 = vrot.slane %v2092_v22, 1  ;;  %v2087_v24 = vadd.f32 %v2086_v61, %v2085_v20 }
 0x512   :  { %v2094_v25 = vadd.f32 %v2093_v23, %v2092_v22  ;;  %v2095_v26 = vmul.f32 0.5, %v2087_v24 }
 0x514   :  { %v2096_v27 = vmul.f32 0.5, %v2094_v25  ;;  %v2097_v28 = vmul.f32 %v2095_v26, %v2095_v26  ;;  %v2100_v38 = vsub.f32 %v2079_v9, %v2095_v26  ;;  %v2259_v26 = vld [vmem:[#allocation2 + $0xc0] sm:$0xff] }
 0x516   :  { %v2098_v31 = vsub.f32 %v2096_v27, %v2097_v28  ;;  %v2260_v27 = vld [vmem:[#allocation2 + $0xc8] sm:$0xff]  ;;  %v2261_v28 = vld [vmem:[#allocation2 + $0xd0] sm:$0xff] }
 0x518   :  { %v2099_v32 = vmax.f32 %v2098_v31, 0.0  ;;  %v2262_v31 = vld [vmem:[#allocation2 + $0xd8] sm:$0xff] }
 0x51a   :  { %v2101_v37 = vadd.f32 1e-05, %v2099_v32  ;;  %v2263_v32 = vld [vmem:[#allocation2 + $0xe0] sm:$0xff] }
 0x51c   :  { %3635 = vrsqrt.f32 %v2101_v37  ;;  %v2264_v37 = vld [vmem:[#allocation2 + $0xe8] sm:$0xff] }
 0x526   :  { %v3636_v39 = vpop.eup %3635 }
 0x527   :  { %v2103_v40 = vmul.f32 %v3636_v39, %v2100_v38  ;;  %v2265_v38 = vld [vmem:[#allocation2 + $0xf0] sm:$0xff]  ;;  %v2266_v39 = vld [vmem:[#allocation2 + $0xf8] sm:$0xff] }
 0x529   :  { %v2113_v41 = vpack.c.bf16 %v2103_v40, %v2103_v40 }
 0x52b   :  { %3252 = vmatmul.mubr.bf16.vlgmr.msra.gmra.mrb[24].mxu0 %v2113_v41 }
 0x52c   :  { %3291 = vmatprep.mubr.msk.bf16.mxu0 %vm3827_vm0, %v3826_v34  ;;  %3276 = vmatpush3.bf16.msra.mxu0 %v2259_v26 }
 0x52d   :  { %3277 = vmatprep.subr.bf16.mxu0 %v3826_v34 }
 0x530   :  { %3278 = vmatpush3.bf16.msra.mxu0 %v2260_v27 }
 0x531   :  { %3279 = vmatprep.subr.bf16.mxu0 %v3826_v34 }
 0x534   :  { %3280 = vmatpush3.bf16.msra.mxu0 %v2261_v28 }
 0x535   :  { %3281 = vmatprep.subr.bf16.mxu0 %v3826_v34 }
 0x538   :  { %3282 = vmatpush3.bf16.msra.mxu0 %v2262_v31 }
 0x539   :  { %3283 = vmatprep.subr.bf16.mxu0 %v3826_v34 }
 0x53c   :  { %3284 = vmatpush3.bf16.msra.mxu0 %v2263_v32 }
 0x53d   :  { %3285 = vmatprep.subr.bf16.mxu0 %v3826_v34 }
 0x540   :  { %3286 = vmatpush3.bf16.msra.mxu0 %v2264_v37 }
 0x541   :  { %3287 = vmatprep.subr.bf16.mxu0 %v3826_v34 }
 0x544   :  { %3288 = vmatpush3.bf16.msra.mxu0 %v2265_v38 }
 0x545   :  { %3289 = vmatprep.subr.bf16.mxu0 %v3826_v34 }
 0x548   :  { %3290 = vmatpush3.bf16.msra.mxu0 %v2266_v39 }
 0x549   :  { %3315 = vmatprep.subr.bf16.mxu0 %v3826_v34 }
 0x5fe   :  { %v2148_v57 = vpop.f32.mrb[24].mxu0 }
 0x5ff   :  { %v2149_v58 = vadd.f32 %v2148_v57, %v4157_v1  ;;  %v3253_v59 = vpop.f32.mrb[25].mxu0 }
 0x600   :  { %v2151_v60 = vpop.f32.mrb[26].mxu0 }
 0x601   :  { %vm2154_vm4 = vcmp.gt.f32.partialorder %v2149_v58, 0.0  ;;  %v2155_v62 = vmul.f32 0.2, %v2149_v58  ;;  %v3254_v63 = vpop.f32.mrb[27].mxu0 }
 0x603   :  { %v2156_v2 = vsel %vm2154_vm4, %v2149_v58, %v2155_v62 }
 0x604   :  { %v2157_v3 = vmul.f32 %v2156_v2, %v2156_v2  ;;  %v2158_v45 = vsel %vm1875_vm1, %v2156_v2, 0.0 }
 0x605   :  { %v2159_v55 = vrot.slane %v2158_v45, 4 }
 0x606   :  { %v2165_v4 = vsel %vm1875_vm1, %v2157_v3, 0.0 }
 0x607   :  { %v2160_v5 = vadd.f32 %v2159_v55, %v2158_v45  ;;  %v2166_v6 = vrot.slane %v2165_v4, 4 }
 0x609   :  { %v2161_v7 = vrot.slane %v2160_v5, 2  ;;  %v2167_v8 = vadd.f32 %v2166_v6, %v2165_v4 }
 0x60b   :  { %v2162_v9 = vadd.f32 %v2161_v7, %v2160_v5  ;;  %v2168_v11 = vrot.slane %v2167_v8, 2 }
 0x60d   :  { %v2163_v13 = vrot.slane %v2162_v9, 1  ;;  %v2169_v1 = vadd.f32 %v2168_v11, %v2167_v8 }
 0x60f   :  { %v2164_v14 = vadd.f32 %v2163_v13, %v2162_v9  ;;  %v2170_v15 = vrot.slane %v2169_v1, 1 }
 0x611   :  { %v2171_v16 = vadd.f32 %v2170_v15, %v2169_v1  ;;  %v2172_v17 = vmul.f32 0.5, %v2164_v14 }
 0x613   :  { %v2173_v18 = vmul.f32 0.5, %v2171_v16  ;;  %v2174_v19 = vmul.f32 %v2172_v17, %v2172_v17  ;;  %v2177_v61 = vsub.f32 %v2156_v2, %v2172_v17  ;;  %v2336_v16 = vld [vmem:[#allocation2 + $0x100] sm:$0xff]  ;;  %v2337_v17 = vld [vmem:[#allocation2 + $0x108] sm:$0xff] }
 0x615   :  { %v2175_v20 = vsub.f32 %v2173_v18, %v2174_v19  ;;  %v2338_v18 = vld [vmem:[#allocation2 + $0x110] sm:$0xff]  ;;  %v2339_v19 = vld [vmem:[#allocation2 + $0x118] sm:$0xff] }
 0x617   :  { %v2176_v21 = vmax.f32 %v2175_v20, 0.0  ;;  %v2340_v20 = vld [vmem:[#allocation2 + $0x120] sm:$0xff] }
 0x619   :  { %v2178_v22 = vadd.f32 1e-05, %v2176_v21  ;;  %v2341_v21 = vld [vmem:[#allocation2 + $0x128] sm:$0xff] }
 0x61b   :  { %3637 = vrsqrt.f32 %v2178_v22  ;;  %v2342_v22 = vld [vmem:[#allocation2 + $0x130] sm:$0xff] }
 0x625   :  { %v3638_v23 = vpop.eup %3637 }
 0x626   :  { %v2180_v24 = vmul.f32 %v3638_v23, %v2177_v61  ;;  %v2343_v61 = vld [vmem:[#allocation2 + $0x138] sm:$0xff] }
 0x628   :  { %v2190_v25 = vpack.c.bf16 %v2180_v24, %v2180_v24 }
 0x62a   :  { %3272 = vmatmul.mubr.bf16.vlgmr.msra.gmra.mrb[24].mxu1 %v2190_v25 }
 0x62b   :  { %3311 = vmatprep.mubr.msk.bf16.mxu1 %vm3827_vm0, %v3826_v34  ;;  %3296 = vmatpush3.bf16.msra.mxu1 %v2336_v16 }
 0x62c   :  { %3297 = vmatprep.subr.bf16.mxu1 %v3826_v34 }
 0x62f   :  { %3298 = vmatpush3.bf16.msra.mxu1 %v2337_v17 }
 0x630   :  { %3299 = vmatprep.subr.bf16.mxu1 %v3826_v34 }
 0x633   :  { %3300 = vmatpush3.bf16.msra.mxu1 %v2338_v18 }
 0x634   :  { %3301 = vmatprep.subr.bf16.mxu1 %v3826_v34 }
 0x637   :  { %3302 = vmatpush3.bf16.msra.mxu1 %v2339_v19 }
 0x638   :  { %3303 = vmatprep.subr.bf16.mxu1 %v3826_v34 }
 0x63b   :  { %3304 = vmatpush3.bf16.msra.mxu1 %v2340_v20 }
 0x63c   :  { %3305 = vmatprep.subr.bf16.mxu1 %v3826_v34 }
 0x63f   :  { %3306 = vmatpush3.bf16.msra.mxu1 %v2341_v21 }
 0x640   :  { %3307 = vmatprep.subr.bf16.mxu1 %v3826_v34 }
 0x643   :  { %3308 = vmatpush3.bf16.msra.mxu1 %v2342_v22 }
 0x644   :  { %3309 = vmatprep.subr.bf16.mxu1 %v3826_v34 }
 0x647   :  { %3310 = vmatpush3.bf16.msra.mxu1 %v2343_v61 }
 0x648   :  { %3335 = vmatprep.subr.bf16.mxu1 %v3826_v34 }
 0x6fd   :  { %v2225_v40 = vpop.f32.mrb[24].mxu1 }
 0x6fe   :  { %v2226_v41 = vadd.f32 %v2225_v40, %v4171_v29  ;;  %v3273_v43 = vpop.f32.mrb[25].mxu1 }
 0x6ff   :  { %v2228_v44 = vpop.f32.mrb[26].mxu1 }
 0x700   :  { %vm2231_vm5 = vcmp.gt.f32.partialorder %v2226_v41, 0.0  ;;  %v2232_v47 = vmul.f32 0.2, %v2226_v41  ;;  %v3274_v48 = vpop.f32.mrb[27].mxu1 }
 0x702   :  { %v2233_v50 = vsel %vm2231_vm5, %v2226_v41, %v2232_v47 }
 0x703   :  { %v2234_v52 = vmul.f32 %v2233_v50, %v2233_v50  ;;  %v2235_v53 = vsel %vm1875_vm1, %v2233_v50, 0.0 }
 0x704   :  { %v2236_v54 = vrot.slane %v2235_v53, 4 }
 0x705   :  { %v2242_v57 = vsel %vm1875_vm1, %v2234_v52, 0.0 }
 0x706   :  { %v2237_v58 = vadd.f32 %v2236_v54, %v2235_v53  ;;  %v2243_v59 = vrot.slane %v2242_v57, 4 }
 0x708   :  { %v2238_v60 = vrot.slane %v2237_v58, 2  ;;  %v2244_v62 = vadd.f32 %v2243_v59, %v2242_v57 }
 0x70a   :  { %v2239_v63 = vadd.f32 %v2238_v60, %v2237_v58  ;;  %v2245_v2 = vrot.slane %v2244_v62, 2 }
 0x70c   :  { %v2240_v3 = vrot.slane %v2239_v63, 1  ;;  %v2246_v29 = vadd.f32 %v2245_v2, %v2244_v62 }
 0x70e   :  { %v2241_v45 = vadd.f32 %v2240_v3, %v2239_v63  ;;  %v2247_v55 = vrot.slane %v2246_v29, 1 }
 0x710   :  { %v2248_v4 = vadd.f32 %v2247_v55, %v2246_v29  ;;  %v2249_v5 = vmul.f32 0.5, %v2241_v45  ;;  %v2413_v55 = vld [vmem:[#allocation2 + $0x140] sm:$0xff] }
 0x712   :  { %v2250_v6 = vmul.f32 0.5, %v2248_v4  ;;  %v2251_v7 = vmul.f32 %v2249_v5, %v2249_v5  ;;  %v2254_v13 = vsub.f32 %v2233_v50, %v2249_v5  ;;  %v2414_v4 = vld [vmem:[#allocation2 + $0x148] sm:$0xff]  ;;  %v2415_v5 = vld [vmem:[#allocation2 + $0x150] sm:$0xff] }
 0x714   :  { %v2252_v8 = vsub.f32 %v2250_v6, %v2251_v7  ;;  %v2416_v6 = vld [vmem:[#allocation2 + $0x158] sm:$0xff]  ;;  %v2417_v7 = vld [vmem:[#allocation2 + $0x160] sm:$0xff] }
 0x716   :  { %v2253_v9 = vmax.f32 %v2252_v8, 0.0  ;;  %v2418_v8 = vld [vmem:[#allocation2 + $0x168] sm:$0xff] }
 0x718   :  { %v2255_v11 = vadd.f32 1e-05, %v2253_v9  ;;  %v2419_v9 = vld [vmem:[#allocation2 + $0x170] sm:$0xff] }
 0x71a   :  { %3639 = vrsqrt.f32 %v2255_v11  ;;  %v2420_v11 = vld [vmem:[#allocation2 + $0x178] sm:$0xff] }
 0x724   :  { %v3640_v1 = vpop.eup %3639 }
 0x725   :  { %v2257_v14 = vmul.f32 %v3640_v1, %v2254_v13 }
 0x727   :  { %v2267_v15 = vpack.c.bf16 %v2257_v14, %v2257_v14 }
 0x729   :  { %3292 = vmatmul.mubr.bf16.vlgmr.msra.gmra.mrb[28].mxu0 %v2267_v15 }
 0x72a   :  { %3331 = vmatprep.mubr.msk.bf16.mxu0 %vm3827_vm0, %v3826_v34  ;;  %3316 = vmatpush3.bf16.msra.mxu0 %v2413_v55 }
 0x72b   :  { %3317 = vmatprep.subr.bf16.mxu0 %v3826_v34 }
 0x72e   :  { %3318 = vmatpush3.bf16.msra.mxu0 %v2414_v4 }
 0x72f   :  { %3319 = vmatprep.subr.bf16.mxu0 %v3826_v34 }
 0x732   :  { %3320 = vmatpush3.bf16.msra.mxu0 %v2415_v5 }
 0x733   :  { %3321 = vmatprep.subr.bf16.mxu0 %v3826_v34 }
 0x736   :  { %3322 = vmatpush3.bf16.msra.mxu0 %v2416_v6 }
 0x737   :  { %3323 = vmatprep.subr.bf16.mxu0 %v3826_v34 }
 0x73a   :  { %3324 = vmatpush3.bf16.msra.mxu0 %v2417_v7 }
 0x73b   :  { %3325 = vmatprep.subr.bf16.mxu0 %v3826_v34 }
 0x73e   :  { %3326 = vmatpush3.bf16.msra.mxu0 %v2418_v8 }
 0x73f   :  { %3327 = vmatprep.subr.bf16.mxu0 %v3826_v34 }
 0x742   :  { %3328 = vmatpush3.bf16.msra.mxu0 %v2419_v9 }
 0x743   :  { %3329 = vmatprep.subr.bf16.mxu0 %v3826_v34 }
 0x746   :  { %3330 = vmatpush3.bf16.msra.mxu0 %v2420_v11 }
 0x747   :  { %3355 = vmatprep.subr.bf16.mxu0 %v3826_v34 }
 0x7fc   :  { %v2302_v23 = vpop.f32.mrb[28].mxu0 }
 0x7fd   :  { %v2303_v24 = vadd.f32 %v2302_v23, %v4175_v33  ;;  %v3293_v25 = vpop.f32.mrb[29].mxu0 }
 0x7fe   :  { %v2305_v26 = vpop.f32.mrb[30].mxu0 }
 0x7ff   :  { %vm2308_vm6 = vcmp.gt.f32.partialorder %v2303_v24, 0.0  ;;  %v2309_v27 = vmul.f32 0.2, %v2303_v24  ;;  %v3294_v28 = vpop.f32.mrb[31].mxu0 }
 0x801   :  { %v2310_v31 = vsel %vm2308_vm6, %v2303_v24, %v2309_v27 }
 0x802   :  { %v2311_v32 = vmul.f32 %v2310_v31, %v2310_v31  ;;  %v2312_v37 = vsel %vm1875_vm1, %v2310_v31, 0.0 }
 0x803   :  { %v2313_v38 = vrot.slane %v2312_v37, 4 }
 0x804   :  { %v2319_v39 = vsel %vm1875_vm1, %v2311_v32, 0.0 }
 0x805   :  { %v2314_v40 = vadd.f32 %v2313_v38, %v2312_v37  ;;  %v2320_v41 = vrot.slane %v2319_v39, 4 }
 0x807   :  { %v2315_v43 = vrot.slane %v2314_v40, 2  ;;  %v2321_v44 = vadd.f32 %v2320_v41, %v2319_v39 }
 0x809   :  { %v2316_v47 = vadd.f32 %v2315_v43, %v2314_v40  ;;  %v2322_v48 = vrot.slane %v2321_v44, 2 }
 0x80b   :  { %v2317_v50 = vrot.slane %v2316_v47, 1  ;;  %v2323_v33 = vadd.f32 %v2322_v48, %v2321_v44 }
 0x80d   :  { %v2318_v52 = vadd.f32 %v2317_v50, %v2316_v47  ;;  %v2324_v53 = vrot.slane %v2323_v33, 1 }
 0x80f   :  { %v2325_v54 = vadd.f32 %v2324_v53, %v2323_v33  ;;  %v2326_v57 = vmul.f32 0.5, %v2318_v52  ;;  %v2490_v52 = vld [vmem:[#allocation2 + $0x180] sm:$0xff]  ;;  %v2491_v53 = vld [vmem:[#allocation2 + $0x188] sm:$0xff] }
 0x811   :  { %v2327_v58 = vmul.f32 0.5, %v2325_v54  ;;  %v2328_v59 = vmul.f32 %v2326_v57, %v2326_v57  ;;  %v2331_v2 = vsub.f32 %v2310_v31, %v2326_v57  ;;  %v2492_v54 = vld [vmem:[#allocation2 + $0x190] sm:$0xff]  ;;  %v2493_v57 = vld [vmem:[#allocation2 + $0x198] sm:$0xff] }
 0x813   :  { %v2329_v60 = vsub.f32 %v2327_v58, %v2328_v59  ;;  %v2494_v58 = vld [vmem:[#allocation2 + $0x1a0] sm:$0xff]  ;;  %v2495_v59 = vld [vmem:[#allocation2 + $0x1a8] sm:$0xff] }
 0x815   :  { %v2330_v62 = vmax.f32 %v2329_v60, 0.0  ;;  %v2496_v60 = vld [vmem:[#allocation2 + $0x1b0] sm:$0xff] }
 0x817   :  { %v2332_v63 = vadd.f32 1e-05, %v2330_v62  ;;  %v2497_v62 = vld [vmem:[#allocation2 + $0x1b8] sm:$0xff] }
 0x819   :  { %3641 = vrsqrt.f32 %v2332_v63 }
 0x823   :  { %v3642_v3 = vpop.eup %3641 }
 0x824   :  { %v2334_v29 = vmul.f32 %v3642_v3, %v2331_v2 }
 0x826   :  { %v2344_v45 = vpack.c.bf16 %v2334_v29, %v2334_v29 }
 0x828   :  { %3312 = vmatmul.mubr.bf16.vlgmr.msra.gmra.mrb[28].mxu1 %v2344_v45 }
 0x829   :  { %3351 = vmatprep.mubr.msk.bf16.mxu1 %vm3827_vm0, %v3826_v34  ;;  %3336 = vmatpush3.bf16.msra.mxu1 %v2490_v52 }
 0x82a   :  { %3337 = vmatprep.subr.bf16.mxu1 %v3826_v34 }
 0x82d   :  { %3338 = vmatpush3.bf16.msra.mxu1 %v2491_v53 }
 0x82e   :  { %3339 = vmatprep.subr.bf16.mxu1 %v3826_v34 }
 0x831   :  { %3340 = vmatpush3.bf16.msra.mxu1 %v2492_v54 }
 0x832   :  { %3341 = vmatprep.subr.bf16.mxu1 %v3826_v34 }
 0x835   :  { %3342 = vmatpush3.bf16.msra.mxu1 %v2493_v57 }
 0x836   :  { %3343 = vmatprep.subr.bf16.mxu1 %v3826_v34 }
 0x839   :  { %3344 = vmatpush3.bf16.msra.mxu1 %v2494_v58 }
 0x83a   :  { %3345 = vmatprep.subr.bf16.mxu1 %v3826_v34 }
 0x83d   :  { %3346 = vmatpush3.bf16.msra.mxu1 %v2495_v59 }
 0x83e   :  { %3347 = vmatprep.subr.bf16.mxu1 %v3826_v34 }
 0x841   :  { %3348 = vmatpush3.bf16.msra.mxu1 %v2496_v60 }
 0x842   :  { %3349 = vmatprep.subr.bf16.mxu1 %v3826_v34 }
 0x845   :  { %3350 = vmatpush3.bf16.msra.mxu1 %v2497_v62 }
 0x8fb   :  { %v2379_v13 = vpop.f32.mrb[28].mxu1 }
 0x8fc   :  { %v2380_v1 = vadd.f32 %v2379_v13, %v4173_v30  ;;  %v3313_v14 = vpop.f32.mrb[29].mxu1 }
 0x8fd   :  { %v2382_v15 = vpop.f32.mrb[30].mxu1 }
 0x8fe   :  { %vm2385_vm7 = vcmp.gt.f32.partialorder %v2380_v1, 0.0  ;;  %v2386_v16 = vmul.f32 0.2, %v2380_v1  ;;  %v3314_v17 = vpop.f32.mrb[31].mxu1 }
 0x900   :  { %v2387_v18 = vsel %vm2385_vm7, %v2380_v1, %v2386_v16 }
 0x901   :  { %v2388_v19 = vmul.f32 %v2387_v18, %v2387_v18  ;;  %v2389_v20 = vsel %vm1875_vm1, %v2387_v18, 0.0 }
 0x902   :  { %v2390_v21 = vrot.slane %v2389_v20, 4 }
 0x903   :  { %v2396_v22 = vsel %vm1875_vm1, %v2388_v19, 0.0 }
 0x904   :  { %v2391_v61 = vadd.f32 %v2390_v21, %v2389_v20  ;;  %v2397_v23 = vrot.slane %v2396_v22, 4 }
 0x906   :  { %v2392_v24 = vrot.slane %v2391_v61, 2  ;;  %v2398_v25 = vadd.f32 %v2397_v23, %v2396_v22 }
 0x908   :  { %v2393_v26 = vadd.f32 %v2392_v24, %v2391_v61  ;;  %v2399_v27 = vrot.slane %v2398_v25, 2 }
 0x90a   :  { %v2394_v28 = vrot.slane %v2393_v26, 1  ;;  %v2400_v30 = vadd.f32 %v2399_v27, %v2398_v25 }
 0x90c   :  { %v2395_v31 = vadd.f32 %v2394_v28, %v2393_v26  ;;  %v2401_v32 = vrot.slane %v2400_v30, 1 }
 0x90e   :  { %v2402_v37 = vadd.f32 %v2401_v32, %v2400_v30  ;;  %v2403_v38 = vmul.f32 0.5, %v2395_v31  ;;  %v2567_v30 = vld [vmem:[#allocation2 + $0x1c0] sm:$0xff]  ;;  %v2568_v31 = vld [vmem:[#allocation2 + $0x1c8] sm:$0xff]  ;;  %v2569_v32 = vld [vmem:[#allocation2 + $0x1d0] sm:$0xff] }
 0x910   :  { %v2404_v39 = vmul.f32 0.5, %v2402_v37  ;;  %v2405_v40 = vmul.f32 %v2403_v38, %v2403_v38  ;;  %v2408_v47 = vsub.f32 %v2387_v18, %v2403_v38  ;;  %v2570_v37 = vld [vmem:[#allocation2 + $0x1d8] sm:$0xff]  ;;  %v2571_v38 = vld [vmem:[#allocation2 + $0x1e0] sm:$0xff] }
 0x912   :  { %v2406_v41 = vsub.f32 %v2404_v39, %v2405_v40  ;;  %v2572_v39 = vld [vmem:[#allocation2 + $0x1e8] sm:$0xff]  ;;  %v2573_v40 = vld [vmem:[#allocation2 + $0x1f0] sm:$0xff] }
 0x914   :  { %v2407_v43 = vmax.f32 %v2406_v41, 0.0  ;;  %v2574_v41 = vld [vmem:[#allocation2 + $0x1f8] sm:$0xff] }
 0x916   :  { %v2409_v44 = vadd.f32 1e-05, %v2407_v43 }
 0x918   :  { %3643 = vrsqrt.f32 %v2409_v44 }
 0x922   :  { %v3644_v48 = vpop.eup %3643 }
 0x923   :  { %v2411_v50 = vmul.f32 %v3644_v48, %v2408_v47 }
 0x925   :  { %v2421_v33 = vpack.c.bf16 %v2411_v50, %v2411_v50 }
 0x927   :  { %3332 = vmatmul.mubr.bf16.vlgmr.msra.gmra.mrb[32].mxu0 %v2421_v33 }
 0x928   :  { %3371 = vmatprep.mubr.msk.bf16.mxu0 %vm3827_vm0, %v3826_v34  ;;  %3356 = vmatpush3.bf16.msra.mxu0 %v2567_v30 }
 0x929   :  { %3357 = vmatprep.subr.bf16.mxu0 %v3826_v34 }
 0x92c   :  { %3358 = vmatpush3.bf16.msra.mxu0 %v2568_v31 }
 0x92d   :  { %3359 = vmatprep.subr.bf16.mxu0 %v3826_v34 }
 0x930   :  { %3360 = vmatpush3.bf16.msra.mxu0 %v2569_v32 }
 0x931   :  { %3361 = vmatprep.subr.bf16.mxu0 %v3826_v34 }
 0x934   :  { %3362 = vmatpush3.bf16.msra.mxu0 %v2570_v37 }
 0x935   :  { %3363 = vmatprep.subr.bf16.mxu0 %v3826_v34 }
 0x938   :  { %3364 = vmatpush3.bf16.msra.mxu0 %v2571_v38 }
 0x939   :  { %3365 = vmatprep.subr.bf16.mxu0 %v3826_v34 }
 0x93c   :  { %3366 = vmatpush3.bf16.msra.mxu0 %v2572_v39 }
 0x93d   :  { %3367 = vmatprep.subr.bf16.mxu0 %v3826_v34 }
 0x940   :  { %3368 = vmatpush3.bf16.msra.mxu0 %v2573_v40 }
 0x941   :  { %3369 = vmatprep.subr.bf16.mxu0 %v3826_v34 }
 0x944   :  { %3370 = vmatpush3.bf16.msra.mxu0 %v2574_v41 }
 0x9fa   :  { %v2456_v63 = vpop.f32.mrb[32].mxu0 }
 0x9fb   :  { %v2457_v2 = vadd.f32 %v2456_v63, %v4177_v36  ;;  %v3333_v3 = vpop.f32.mrb[33].mxu0 }
 0x9fc   :  { %v2459_v29 = vpop.f32.mrb[34].mxu0 }
 0x9fd   :  { %vm2462_vm8 = vcmp.gt.f32.partialorder %v2457_v2, 0.0  ;;  %v2463_v45 = vmul.f32 0.2, %v2457_v2  ;;  %v3334_v55 = vpop.f32.mrb[35].mxu0 }
 0x9ff   :  { %v2464_v4 = vsel %vm2462_vm8, %v2457_v2, %v2463_v45 }
 0xa00   :  { %v2465_v5 = vmul.f32 %v2464_v4, %v2464_v4  ;;  %v2466_v6 = vsel %vm1875_vm1, %v2464_v4, 0.0 }
 0xa01   :  { %v2467_v7 = vrot.slane %v2466_v6, 4 }
 0xa02   :  { %v2473_v8 = vsel %vm1875_vm1, %v2465_v5, 0.0 }
 0xa03   :  { %v2468_v9 = vadd.f32 %v2467_v7, %v2466_v6  ;;  %v2474_v11 = vrot.slane %v2473_v8, 4 }
 0xa05   :  { %v2469_v13 = vrot.slane %v2468_v9, 2  ;;  %v2475_v1 = vadd.f32 %v2474_v11, %v2473_v8 }
 0xa07   :  { %v2470_v14 = vadd.f32 %v2469_v13, %v2468_v9  ;;  %v2476_v15 = vrot.slane %v2475_v1, 2 }
 0xa09   :  { %v2471_v16 = vrot.slane %v2470_v14, 1  ;;  %v2477_v36 = vadd.f32 %v2476_v15, %v2475_v1 }
 0xa0b   :  { %v2472_v17 = vadd.f32 %v2471_v16, %v2470_v14  ;;  %v2478_v18 = vrot.slane %v2477_v36, 1 }
 0xa0d   :  { %v2479_v19 = vadd.f32 %v2478_v18, %v2477_v36  ;;  %v2480_v20 = vmul.f32 0.5, %v2472_v17 }
 0xa0f   :  { %v2481_v21 = vmul.f32 0.5, %v2479_v19  ;;  %v2482_v22 = vmul.f32 %v2480_v20, %v2480_v20  ;;  %v2485_v25 = vsub.f32 %v2464_v4, %v2480_v20 }
 0xa11   :  { %v2483_v61 = vsub.f32 %v2481_v21, %v2482_v22 }
 0xa13   :  { %v2484_v23 = vmax.f32 %v2483_v61, 0.0 }
 0xa15   :  { %v2486_v24 = vadd.f32 1e-05, %v2484_v23 }
 0xa17   :  { %3645 = vrsqrt.f32 %v2486_v24 }
 0xa21   :  { %v3646_v26 = vpop.eup %3645 }
 0xa22   :  { %v2488_v27 = vmul.f32 %v3646_v26, %v2485_v25 }
 0xa24   :  { %v2498_v28 = vpack.c.bf16 %v2488_v27, %v2488_v27 }
 0xa26   :  { %3352 = vmatmul.mubr.bf16.vlgmr.msra.gmra.mrb[32].mxu1 %v2498_v28 }
 0xaf9   :  { %v2533_v43 = vpop.f32.mrb[32].mxu1 }
 0xafa   :  { %v2534_v44 = vadd.f32 %v2533_v43, %v4202_v35  ;;  %v3353_v47 = vpop.f32.mrb[33].mxu1 }
 0xafb   :  { %v2536_v48 = vpop.f32.mrb[34].mxu1 }
 0xafc   :  { %vm2539_vm9 = vcmp.gt.f32.partialorder %v2534_v44, 0.0  ;;  %v2540_v50 = vmul.f32 0.2, %v2534_v44  ;;  %v3354_v33 = vpop.f32.mrb[35].mxu1 }
 0xafe   :  { %v2541_v52 = vsel %vm2539_vm9, %v2534_v44, %v2540_v50 }
 0xaff   :  { %v2542_v53 = vmul.f32 %v2541_v52, %v2541_v52  ;;  %v2543_v54 = vsel %vm1875_vm1, %v2541_v52, 0.0 }
 0xb00   :  { %v2544_v57 = vrot.slane %v2543_v54, 4 }
 0xb01   :  { %v2550_v58 = vsel %vm1875_vm1, %v2542_v53, 0.0 }
 0xb02   :  { %v2545_v59 = vadd.f32 %v2544_v57, %v2543_v54  ;;  %v2551_v60 = vrot.slane %v2550_v58, 4 }
 0xb04   :  { %v2546_v62 = vrot.slane %v2545_v59, 2  ;;  %v2552_v63 = vadd.f32 %v2551_v60, %v2550_v58 }
 0xb06   :  { %v2547_v2 = vadd.f32 %v2546_v62, %v2545_v59  ;;  %v2553_v3 = vrot.slane %v2552_v63, 2 }
 0xb08   :  { %v2548_v29 = vrot.slane %v2547_v2, 1  ;;  %v2554_v35 = vadd.f32 %v2553_v3, %v2552_v63 }
 0xb0a   :  { %v2549_v45 = vadd.f32 %v2548_v29, %v2547_v2  ;;  %v2555_v55 = vrot.slane %v2554_v35, 1 }
 0xb0c   :  { %v2556_v4 = vadd.f32 %v2555_v55, %v2554_v35  ;;  %v2557_v5 = vmul.f32 0.5, %v2549_v45 }
 0xb0e   :  { %v2558_v6 = vmul.f32 0.5, %v2556_v4  ;;  %v2559_v7 = vmul.f32 %v2557_v5, %v2557_v5  ;;  %v2562_v13 = vsub.f32 %v2541_v52, %v2557_v5 }
 0xb10   :  { %v2560_v8 = vsub.f32 %v2558_v6, %v2559_v7 }
 0xb12   :  { %v2561_v9 = vmax.f32 %v2560_v8, 0.0 }
 0xb14   :  { %v2563_v11 = vadd.f32 1e-05, %v2561_v9 }
 0xb16   :  { %3647 = vrsqrt.f32 %v2563_v11 }
 0xb20   :  { %v3648_v1 = vpop.eup %3647 }
 0xb21   :  { %v2565_v14 = vmul.f32 %v3648_v1, %v2562_v13 }
 0xb23   :  { %v2575_v15 = vpack.c.bf16 %v2565_v14, %v2565_v14 }
 0xb25   :  { %3372 = vmatmul.mubr.bf16.vlgmr.msra.gmra.mrb[36].mxu0 %v2575_v15 }
 0xbf8   :  { %v2610_v16 = vpop.f32.mrb[36].mxu0 }
 0xbf9   :  { %v2611_v36 = vadd.f32 %v2610_v16, %v4204_v56  ;;  %v3373_v17 = vpop.f32.mrb[37].mxu0 }
 0xbfa   :  { %v2613_v18 = vpop.f32.mrb[38].mxu0 }
 0xbfb   :  { %vm2616_vm10 = vcmp.gt.f32.partialorder %v2611_v36, 0.0  ;;  %v2617_v19 = vmul.f32 0.2, %v2611_v36  ;;  %v3374_v20 = vpop.f32.mrb[39].mxu0 }
 0xbfd   :  { %v2618_v21 = vsel %vm2616_vm10, %v2611_v36, %v2617_v19 }
 0xbfe   :  { %v2619_v22 = vmul.f32 %v2618_v21, %v2618_v21  ;;  %v2620_v61 = vsel %vm1875_vm1, %v2618_v21, 0.0 }
 0xbff   :  { %v2621_v23 = vrot.slane %v2620_v61, 4 }
 0xc00   :  { %v2627_v24 = vsel %vm1875_vm1, %v2619_v22, 0.0 }
 0xc01   :  { %v2622_v25 = vadd.f32 %v2621_v23, %v2620_v61  ;;  %v2628_v26 = vrot.slane %v2627_v24, 4 }
 0xc03   :  { %v2623_v27 = vrot.slane %v2622_v25, 2  ;;  %v2629_v28 = vadd.f32 %v2628_v26, %v2627_v24 }
 0xc05   :  { %v2624_v30 = vadd.f32 %v2623_v27, %v2622_v25  ;;  %v2630_v31 = vrot.slane %v2629_v28, 2 }
 0xc07   :  { %v2625_v32 = vrot.slane %v2624_v30, 1  ;;  %v2631_v56 = vadd.f32 %v2630_v31, %v2629_v28 }
 0xc09   :  { %v2626_v37 = vadd.f32 %v2625_v32, %v2624_v30  ;;  %v2632_v38 = vrot.slane %v2631_v56, 1 }
 0xc0b   :  { %v2633_v39 = vadd.f32 %v2632_v38, %v2631_v56  ;;  %v2634_v40 = vmul.f32 0.5, %v2626_v37 }
 0xc0d   :  { %v2635_v41 = vmul.f32 0.5, %v2633_v39  ;;  %v2636_v43 = vmul.f32 %v2634_v40, %v2634_v40  ;;  %v2639_v50 = vsub.f32 %v2618_v21, %v2634_v40 }
 0xc0f   :  { %v2637_v44 = vsub.f32 %v2635_v41, %v2636_v43 }
 0xc11   :  { %v2638_v47 = vmax.f32 %v2637_v44, 0.0 }
 0xc13   :  { %v2640_v48 = vadd.f32 1e-05, %v2638_v47 }
 0xc15   :  { %3649 = vrsqrt.f32 %v2640_v48 }
 0xc1f   :  { %v3650_v33 = vpop.eup %3649 }
 0xc20   :  { %v2642_v52 = vmul.f32 %v3650_v33, %v2639_v50 }
 0xc21   :  { %3811 = dma.done.wait [#allocation4 + $0x1], 3072 }
 0xc22   :  { %3812 = vsyncadd [#allocation4 + $0x1], 4294964224  ;;  %3375 = vmatprep.subr.bf16.mxu1 %v3826_v34  ;;  %2704 = vmatprep.mubr.bf16.mxu0 %v3825_v12  ;;  %2774 = vst [vmem:[#allocation12 - $0x2] sm:$0xc] %v4161_v10  ;;  %v2648_v53 = vld [vmem:[#allocation3 + $0x8] sm:$0xff]  ;;  %v2647_v54 = vld [vmem:[#allocation3] sm:$0xff]  ;;  %v2671_v13 = vpack.c.bf16 %v2642_v52, %v2642_v52 }
 0xc23   :  { %2775 = vst [vmem:[#allocation14 - $0x2] sm:$0xc] %v4155_v0  ;;  %3391 = vmatprep.mubr.msk.bf16.mxu1 %vm3827_vm0, %v3826_v34  ;;  %v2649_v57 = vld [vmem:[#allocation3 + $0x10] sm:$0xff]  ;;  %2672 = vmatprep.subr.bf16.mxu0 %v2648_v53  ;;  %v2651_v58 = vld [vmem:[#allocation3 + $0x20] sm:$0xff]  ;;  %v2652_v59 = vld [vmem:[#allocation3 + $0x28] sm:$0xff]  ;;  %s3828_s8 = smov [#allocation12]  }
 0xc24   :  { %3376 = vmatpush3.bf16.msra.mxu1 %v2649_v57  ;;  %2673 = vmatpush1.bf16.msra.mxu0 %v2647_v54  ;;  %v2650_v60 = vld [vmem:[#allocation3 + $0x18] sm:$0xff]  ;;  %v2655_v0 = vld [vmem:[#allocation3 + $0x40] sm:$0xff]  ;;  %v2653_v10 = vld [vmem:[#allocation3 + $0x30] sm:$0xff]  ;;  %s2792_s29 = sshll.u32 %s3828_s8, 4  ;;  %s2793_s29 = int_to_ptr.vmem [resolvable:$true] %s2792_s29 }
 0xc25   :  { %3377 = vmatprep.subr.bf16.mxu1 %v3826_v34  ;;  %2674 = vmatprep.subr.bf16.mxu0 %v2651_v58  ;;  %v2654_v12 = vld [vmem:[#allocation3 + $0x38] sm:$0xff]  ;;  %v2657_v62 = vld [vmem:[#allocation3 + $0x50] sm:$0xff]  ;;  %v2656_v2 = vld [vmem:[#allocation3 + $0x48] sm:$0xff]  ;;  %s3739_s3 = scalar_lea.vmem %s2793_s29, 32  ;;  %p3744_p5 = scmp.lt.s32.totalorder %s2793_s29, %s2793_s29 }
 0xc26   :  { %v2658_v63 = vld [vmem:[#allocation3 + $0x58] sm:$0xff]  ;;  %v2660_v3 = vld [vmem:[#allocation3 + $0x68] sm:$0xff]  ;;  %v2661_v29 = vld [vmem:[#allocation3 + $0x70] sm:$0xff]  ;;  %p3740_p4 = scmp.ne.s32.totalorder %s2793_s29, %s3739_s3  ;;  %p3745_p6 = scmp.lt.s32.totalorder %s3739_s3, %s3739_s3 }
 0xc27   :  { %v2659_v35 = vld [vmem:[#allocation3 + $0x60] sm:$0xff]  ;;  %v2664_v55 = vld [vmem:[#allocation3 + $0x88] sm:$0xff]  ;;  %v2662_v4 = vld [vmem:[#allocation3 + $0x78] sm:$0xff] }
 0xc28   :  { %3378 = vmatpush3.bf16.msra.mxu1 %v2652_v59  ;;  %2675 = vmatpush1.bf16.msra.mxu0 %v2650_v60  ;;  %v2663_v45 = vld [vmem:[#allocation3 + $0x80] sm:$0xff]  ;;  %v2666_v5 = vld [vmem:[#allocation3 + $0x98] sm:$0xff]  ;;  %v2665_v7 = vld [vmem:[#allocation3 + $0x90] sm:$0xff]  ;;  %p3746_p7 = por %p3745_p6, %p3744_p5 }
 0xc29   :  { %3379 = vmatprep.subr.bf16.mxu1 %v3826_v34  ;;  %2676 = vmatprep.subr.bf16.mxu0 %v2654_v12  ;;  %v2667_v6 = vld [vmem:[#allocation3 + $0xa0] sm:$0xff]  ;;  %v2669_v8 = vld [vmem:[#allocation3 + $0xb0] sm:$0xff]  ;;  %v2670_v9 = vld [vmem:[#allocation3 + $0xb8] sm:$0xff] }
 0xc2a   :  { %v2668_v11 = vld [vmem:[#allocation3 + $0xa8] sm:$0xff]  ;;  %p3747_p8 = pnand %p3746_p7, %p3740_p4 }
 0xc2c   :  { %3380 = vmatpush3.bf16.msra.mxu1 %v2655_v0  ;;  %2677 = vmatpush1.bf16.msra.mxu0 %v2653_v10 }
 0xc2d   :  { %3381 = vmatprep.subr.bf16.mxu1 %v3826_v34  ;;  %2678 = vmatprep.subr.bf16.mxu0 %v2657_v62 }
 0xc30   :  { %3382 = vmatpush3.bf16.msra.mxu1 %v2658_v63  ;;  %2679 = vmatpush1.bf16.msra.mxu0 %v2656_v2 }
 0xc31   :  { %3383 = vmatprep.subr.bf16.mxu1 %v3826_v34  ;;  %2680 = vmatprep.subr.bf16.mxu0 %v2660_v3 }
 0xc34   :  { %3384 = vmatpush3.bf16.msra.mxu1 %v2661_v29  ;;  %2681 = vmatpush1.bf16.msra.mxu0 %v2659_v35 }
 0xc35   :  { %3385 = vmatprep.subr.bf16.mxu1 %v3826_v34  ;;  %2682 = vmatprep.subr.bf16.mxu0 %v2663_v45 }
 0xc38   :  { %3386 = vmatpush3.bf16.msra.mxu1 %v2664_v55  ;;  %2683 = vmatpush1.bf16.msra.mxu0 %v2662_v4 }
 0xc39   :  { %3387 = vmatprep.subr.bf16.mxu1 %v3826_v34  ;;  %2684 = vmatprep.subr.bf16.mxu0 %v2666_v5 }
 0xc3c   :  { %3388 = vmatpush3.bf16.msra.mxu1 %v2667_v6  ;;  %2685 = vmatpush1.bf16.msra.mxu0 %v2665_v7 }
 0xc3d   :  { %3389 = vmatprep.subr.bf16.mxu1 %v3826_v34  ;;  %2686 = vmatprep.subr.bf16.mxu0 %v2669_v8 }
 0xc40   :  { %3390 = vmatpush3.bf16.msra.mxu1 %v2670_v9  ;;  %2687 = vmatpush1.bf16.msra.mxu0 %v2668_v11 }
 0xc43   :  { %3392 = vmatmul.mubr.bf16.vlgmr.msra.gmra.mrb[16].mxu1 %v2671_v13  ;;  %2705 = vmatmul.mubr.bf16.vlgmr.msra.gmra.mrb[16].mxu0 %v2671_v13 }
 0xc44   :  { %3750 = shalt.err (!%p3747_p8)
}
 0xc45   :  { %s3751_s9 = scalar_lea.hbm %s4380_s12, 32 }
 0xc46   :  { %p3752_p9 = scmp.ne.s32.totalorder %s4380_s12, %s3751_s9  ;;  %p3755_p10 = scmp.lt.u32.totalorder %s3751_s9, %s4380_s12 }
 0xc48   :  { %p3757_p11 = pnand %p3755_p10, %p3752_p9 }
 0xc4a   :  { %3760 = shalt.err (!%p3757_p11)
}
 0xc4b   :  { %2795 = dma.vmem_to_hbm [thread:$0]  %s2793_s29, 32, %s4380_s12, [#allocation13]  }
 0xc4c   :  { %s3829_s26 = smov [#allocation14]  }
 0xc4d   :  { %s2802_s16 = sshll.u32 %s3829_s26, 4  ;;  %s2803_s16 = int_to_ptr.vmem [resolvable:$true] %s2802_s16 }
 0xc4e   :  { %s3761_s17 = scalar_lea.vmem %s2803_s16, 32  ;;  %p3766_p13 = scmp.lt.s32.totalorder %s2803_s16, %s2803_s16 }
 0xc4f   :  { %p3762_p12 = scmp.ne.s32.totalorder %s2803_s16, %s3761_s17  ;;  %p3767_p0 = scmp.lt.s32.totalorder %s3761_s17, %s3761_s17 }
 0xc51   :  { %p3768_p1 = por %p3767_p0, %p3766_p13 }
 0xc53   :  { %p3769_p2 = pnand %p3768_p1, %p3762_p12 }
 0xc55   :  { %3772 = shalt.err (!%p3769_p2)
}
 0xc56   :  { %s3773_s20 = scalar_lea.hbm %s4381_s13, 32 }
 0xc57   :  { %p3774_p3 = scmp.ne.s32.totalorder %s4381_s13, %s3773_s20  ;;  %p3777_p4 = scmp.lt.u32.totalorder %s3773_s20, %s4381_s13 }
 0xc59   :  { %p3779_p5 = pnand %p3777_p4, %p3774_p3 }
 0xc5b   :  { %3782 = shalt.err (!%p3779_p5)
}
 0xc5c   :  { %2805 = dma.vmem_to_hbm [thread:$0]  %s2803_s16, 32, %s4381_s13, [#allocation13]   ;;  %v3830_v34 = vmov 1983009808  }
 0xc5d   :  { %v2758_v1 = vunpack.c.l.s4 %v3830_v34  ;;  %s3831_s13 = smov [#allocation11]  }
 0xc5e   :  { %s2782_s24 = sshll.u32 %s3831_s13, 4  ;;  %s2783_s24 = int_to_ptr.vmem [resolvable:$true] %s2782_s24 }
 0xc5f   :  { %v2759_v14 = vunpack.c.0.s8 %v2758_v1  ;;  %s3783_s25 = scalar_lea.vmem %s2783_s24, 96  ;;  %p3788_p7 = scmp.lt.s32.totalorder %s2783_s24, %s2783_s24 }
 0xc60   :  { %p3784_p6 = scmp.ne.s32.totalorder %s2783_s24, %s3783_s25  ;;  %p3789_p8 = scmp.lt.s32.totalorder %s3783_s25, %s3783_s25 }
 0xc61   :  { %v2762_v17 = vsub.s32 %v2759_v14, %v4118_v42 }
 0xc62   :  { %p3790_p9 = por %p3789_p8, %p3788_p7 }
 0xc64   :  { %p3791_p10 = pnand %p3790_p9, %p3784_p6 }
 0xd16   :  { %v2747_v15 = vpop.f32.mrb[16].mxu1  ;;  %v2706_v16 = vpop.f32.mrb[16].mxu0 }
 0xd17   :  { %v3397_v36 = vadd.f32 %v2747_v15, %v4136_v51  ;;  %v3393_v18 = vpop.f32.mrb[17].mxu1  ;;  %v3395_v19 = vadd.f32 %v2706_v16, %v4126_v46  ;;  %v2708_v20 = vpop.f32.mrb[17].mxu0 }
 0xd18   :  { %v2750_v21 = vpop.f32.mrb[18].mxu1  ;;  %v3396_v22 = vadd.f32 %v2708_v20, %v4132_v49  ;;  %v2710_v61 = vpop.f32.mrb[18].mxu0 }
 0xd19   :  { %v3394_v23 = vpop.f32.mrb[19].mxu1  ;;  %v2711_v24 = vpop.f32.mrb[19].mxu0  ;;  %v2770_v25 = vrot.slane %v3397_v36, %v2762_v17 }
 0xd1a   :  { %v2756_v26 = vcombine.low %v3395_v19, %v3396_v22 }
 0xd1c   :  { %v2763_v27 = vrot.slane %v2756_v26, %v2762_v17 }
 0xd1e   :  { %v2771_v28 = vcombine.low %v2763_v27, %v2770_v25 }
 0xd20   :  { %2773 = vst [vmem:[#allocation11] sm:$0x3f] %v2771_v28 }
 0xd21   :  { %3794 = shalt.err (!%p3791_p10)
}
 0xd22   :  { %s3795_s28 = scalar_lea.hbm %s4379_s11, 96 }
 0xd23   :  { %p3796_p11 = scmp.ne.s32.totalorder %s4379_s11, %s3795_s28  ;;  %p3799_p12 = scmp.lt.u32.totalorder %s3795_s28, %s4379_s11 }
 0xd25   :  { %p3801_p13 = pnand %p3799_p12, %p3796_p11 }
 0xd27   :  { %3804 = shalt.err (!%p3801_p13)
}
 0xd28   :  { %2785 = dma.vmem_to_hbm [thread:$0]  %s2783_s24, 96, %s4379_s11, [#allocation7]  }
 0xd29   :  { %3813 = dma.done.wait [#allocation7], 96  }
 0xd2a   :  { %3814 = vsyncadd [#allocation7], 4294967200 }
 0xd2b   :  { %3815 = dma.done.wait [#allocation13], 64  }
 0xd2c   :  { %3816 = vsyncadd [#allocation13], 4294967232 }
 0xd2d   :  { %2815 = vsyncpa [#allocation6], 1 }
 0xd2e   :  { %2816 = vsyncpa [#allocation9], 1 }
 0xd2f   :  { %2817 = vsyncpa [#allocation7], 1 }
 0xd30   :  { %2818 = vsyncpa [#allocation13], 1 }
 0xd31   :  { %2819 = vsyncmov [#allocation4] }
 0xd34   :  { %s2820_s0 = vpop.sfrf %2819 }
 0xd35   :  { %p3008_p0 = scmp.ne.s32.totalorder %s2820_s0, 0 }
 0xd37   :  { %2824 = shalt.err (%p3008_p0)  }
 0xd38   :  { %2826 = vsyncmov [#allocation4 + $0x1] }
 0xd3b   :  { %s2827_s1 = vpop.sfrf %2826 }
 0xd3c   :  { %p3009_p1 = scmp.ne.s32.totalorder %s2827_s1, 0 }
 0xd3e   :  { %2831 = shalt.err (%p3009_p1)  }

</bundles_post_ra>
